<compile_context>
chip_gen: v6e
topology: v6e:2x2x1
jax: 0.10.0
libtpu: 0.0.40
codegen_flags: <defaults>
</compile_context>

<pallas_src>
import jax
import jax.numpy as jnp
from jax import lax
from jax.experimental import pallas as pl
from jax.experimental.pallas import tpu as pltpu


def ssm_gray_con_forward(params, x0, M_flow, DT, D, XMIN, XMAX, UMIN, UMAX,
                         *, time_block=None):
    a_weight, a_scalar, b_weight, e_weight, hf_weight = params
    T, batch, n_m = M_flow.shape
    n_dT = DT.shape[-1]
    nd = D.shape[-1]
    nx = a_weight.shape[0]
    nu = hf_weight.shape[0]
    pd = n_m * n_dT
    assert a_weight.shape == (nx, nx) and a_scalar.shape == (nx, nx)
    assert b_weight.shape == (nx, nu) and e_weight.shape == (nx, nd)
    assert hf_weight.shape == (nu, n_m, n_dT) and x0.shape == (batch, nx)

    f32 = jnp.float32

    # ---------- once-per-call parameter preprocessing (plain JAX, free) ----------
    # effective A, kept UN-transposed; the transpose is folded into dot_general.
    eff_a = ((1.0 - 0.1 * jax.nn.sigmoid(a_scalar.astype(f32)))
             * jax.nn.softmax(a_weight.astype(f32), axis=1))            # (nx, nx)
    # Wf[k, i*n_dT + j] = W[k, i, j]  -> bilinear contraction is one 2-D matmul.
    wf = hf_weight.reshape(nu, pd).astype(f32)                          # (nu, pd)
    # Fused recurrence weight [ B@Wf | E ]:  x += [p | d] @ [BWf | E]^T
    bwfe = jnp.concatenate(
        [b_weight.astype(f32) @ wf, e_weight.astype(f32)], axis=1)      # (nx, pd+nd)

    # ---------- per-step input packing (2 lane-dense streams) ----------
    # P[t,b, i*n_dT + j] = m[t,b,i] * dT[t,b,j]   (bilinear outer product)
    p_outer = jnp.einsum("tbi,tbj->tbij",
                         M_flow.astype(f32), DT.astype(f32)).reshape(T, batch, pd)
    drive = jnp.concatenate([p_outer, D.astype(f32)], axis=-1)          # (T,B,pd+nd)
    bounds = jnp.concatenate([XMIN, XMAX, UMIN, UMAX], axis=-1).astype(f32)  # (T,B,2nx+2nu)

    # ---------- time blocking ----------
    if time_block is None:
        time_block = min(T, 64)          # whole horizon fits trivially in VMEM here
    tb_size = max(1, min(int(time_block), T))
    n_blocks = -(-T // tb_size)
    t_pad = n_blocks * tb_size
    if t_pad != T:
        pad = ((0, t_pad - T), (0, 0), (0, 0))
        drive = jnp.pad(drive, pad)
        bounds = jnp.pad(bounds, pad)

    drive_w = pd + nd
    bnd_w = 2 * nx + 2 * nu
    out_w = 3 * nx + 2 * nu              # [X | Sx_min | Sx_max | Su_min | Su_max]

    contract_last = (((1,), (1,)), ((), ()))   # A @ B^T, contraction on last dims

    def kernel(x0_ref, eff_a_ref, bwfe_ref, wf_ref, drive_ref, bnd_ref,
               out_ref, x_state):
        blk = pl.program_id(0)

        @pl.when(blk == 0)
        def _():
            x_state[...] = x0_ref[...]

        def step(i, x):
            dr = drive_ref[i]                                # (batch, pd+nd)
            # fused recurrence: x <- x @ eff_A^T + [p|d] @ [BWf|E]^T
            ax = lax.dot_general(x, eff_a_ref[...], contract_last,
                                 preferred_element_type=jnp.float32)
            bu_ed = lax.dot_general(dr, bwfe_ref[...], contract_last,
                                    preferred_element_type=jnp.float32)
            x_new = ax + bu_ed
            # u only feeds the slack terms (off the serial recurrence chain)
            u = lax.dot_general(dr[:, :pd], wf_ref[...], contract_last,
                                preferred_element_type=jnp.float32)

            b = bnd_ref[i]                                   # (batch, 2nx+2nu)
            xmin = b[:, :nx]
            xmax = b[:, nx:2 * nx]
            umin = b[:, 2 * nx:2 * nx + nu]
            umax = b[:, 2 * nx + nu:]

            slab = jnp.concatenate(
                [x_new,
                 jnp.maximum(xmin - x_new, 0.0),
                 jnp.maximum(x_new - xmax, 0.0),
                 jnp.maximum(umin - u, 0.0),
                 jnp.maximum(u - umax, 0.0)], axis=-1)       # (batch, out_w)
            out_ref[i] = slab.astype(out_ref.dtype)
            return x_new

        x_state[...] = lax.fori_loop(0, tb_size, step, x_state[...], unroll=True)

    vmem = pltpu.MemorySpace.VMEM

    def resident(shape):
        ndim = len(shape)
        # constant index_map -> Pallas keeps the block resident (no per-block DMA)
        return pl.BlockSpec(shape, lambda blk, _n=ndim: (0,) * _n, memory_space=vmem)

    def per_block(feat):
        return pl.BlockSpec((tb_size, batch, feat), lambda blk: (blk, 0, 0),
                            memory_space=vmem)

    grid_spec = pltpu.PrefetchScalarGridSpec(
        num_scalar_prefetch=0,
        grid=(n_blocks,),
        in_specs=[
            resident((batch, nx)),          # x0
            resident((nx, nx)),             # eff_A (untransposed)
            resident((nx, drive_w)),        # [B@Wf | E]
            resident((nu, pd)),             # Wf (for u / slack terms)
            per_block(drive_w),             # [P | D]
            per_block(bnd_w),               # [XMIN | XMAX | UMIN | UMAX]
        ],
        out_specs=per_block(out_w),
        scratch_shapes=[pltpu.VMEM((batch, nx), f32)],   # carried state x_t
    )

    packed = pl.pallas_call(
        kernel,
        out_shape=jax.ShapeDtypeStruct((t_pad, batch, out_w), f32),
        grid_spec=grid_spec,
        compiler_params=pltpu.CompilerParams(
            # the time-block axis carries the state recurrence -> sequential.
            # (v7x: a NEW leading batch-shard axis may be "parallel"; never this one.)
            dimension_semantics=("arbitrary",),
        ),
    )(x0.astype(f32), eff_a, bwfe, wf, drive, bounds)

    packed = packed[:T]
    X = packed[..., :nx]
    Sx_min = packed[..., nx:2 * nx]
    Sx_max = packed[..., 2 * nx:3 * nx]
    Su_min = packed[..., 3 * nx:3 * nx + nu]
    Su_max = packed[..., 3 * nx + nu:]
    Y = X[:, :, -1]      # torch: Y.append(x[:, -1]) -- a free slice of X
    return X, Y, Sx_min, Sx_max, Su_min, Su_max


def _reference(params, x0, M_flow, DT, D, XMIN, XMAX, UMIN, UMAX):
    a_weight, a_scalar, b_weight, e_weight, hf_weight = params
    hi = lax.Precision.HIGHEST
    s_clamped = 1.0 - 0.1 * jax.nn.sigmoid(a_scalar)
    eff = s_clamped * jax.nn.softmax(a_weight, axis=1)     # un-transposed

    def step(x, inp):
        m, dT, d, xmin, xmax, umin, umax = inp
        u = jnp.einsum("bi,kij,bj->bk", m, hf_weight, dT, precision=hi)
        x_new = (jnp.dot(x, eff.T, precision=hi)
                 + jnp.dot(u, b_weight.T, precision=hi)
                 + jnp.dot(d, e_weight.T, precision=hi))
        outs = (x_new,
                jax.nn.relu(xmin - x_new), jax.nn.relu(x_new - xmax),
                jax.nn.relu(umin - u), jax.nn.relu(u - umax))
        return x_new, outs

    _, (X, Sxmin, Sxmax, Sumin, Sumax) = lax.scan(
        step, x0, (M_flow, DT, D, XMIN, XMAX, UMIN, UMAX))
    return X, X[:, :, -1], Sxmin, Sxmax, Sumin, Sumax


if __name__ == "__main__":
    # Small shapes implied by the module: nx=state, nu=hf output / B input,
    # nd=disturbance, (n_m, n_dT)=bilinear inputs, T=rollout steps, batch rows.
    nx, nu, nd, n_m, n_dT = 32, 16, 8, 16, 8
    T, batch = 6, 8
    f32 = jnp.float32

    ks = jax.random.split(jax.random.PRNGKey(0), 13)
    a_weight = jax.random.uniform(ks[0], (nx, nx), dtype=f32)       # torch.rand
    a_scalar = jax.random.uniform(ks[1], (nx, nx), dtype=f32)       # torch.rand
    b_weight = jax.random.uniform(ks[2], (nx, nu), dtype=f32,
                                  minval=-1.0, maxval=1.0) / jnp.sqrt(nu)
    e_weight = jax.random.uniform(ks[3], (nx, nd), dtype=f32,
                                  minval=-1.0, maxval=1.0) / jnp.sqrt(nd)
    hf_weight = jax.random.uniform(ks[4], (nu, n_m, n_dT), dtype=f32,
                                   minval=-1.0, maxval=1.0) / jnp.sqrt(n_m)
    params = (a_weight, a_scalar, b_weight, e_weight, hf_weight)

    x0 = jax.random.uniform(ks[5], (batch, nx), dtype=f32)
    M_flow = jax.random.uniform(ks[6], (T, batch, n_m), dtype=f32)
    DT = jax.random.uniform(ks[7], (T, batch, n_dT), dtype=f32)
    D = jax.random.uniform(ks[8], (T, batch, nd), dtype=f32)
    XMIN = jax.random.uniform(ks[9], (T, batch, nx), dtype=f32) - 0.5
    XMAX = jax.random.uniform(ks[10], (T, batch, nx), dtype=f32) + 0.5
    UMIN = jax.random.uniform(ks[11], (T, batch, nu), dtype=f32) - 0.5
    UMAX = jax.random.uniform(ks[12], (T, batch, nu), dtype=f32) + 0.5

    outs = ssm_gray_con_forward(params, x0, M_flow, DT, D, XMIN, XMAX, UMIN, UMAX)
    outs = jax.block_until_ready(outs)

    refs = _reference(params, x0, M_flow, DT, D, XMIN, XMAX, UMIN, UMAX)
    names = ("X", "Y", "Sx_min", "Sx_max", "Su_min", "Su_max")
    for name, o, r in zip(names, outs, refs):
        assert o.shape == r.shape, (name, o.shape, r.shape)
        err = float(jnp.max(jnp.abs(o - r)))
        assert jnp.allclose(o, r, atol=1e-4, rtol=1e-4), (name, err)

    print("KERNEL_OK")
</pallas_src>

<mosaic_0001>
module attributes {stable_mosaic.version = 11 : i64} {
  func.func @kernel(%arg0: i32, %arg1: memref<8x32xf32, #tpu.memory_space<vmem>>, %arg2: memref<32x32xf32, #tpu.memory_space<vmem>>, %arg3: memref<32x136xf32, #tpu.memory_space<vmem>>, %arg4: memref<16x128xf32, #tpu.memory_space<vmem>>, %arg5: memref<6x8x136xf32, #tpu.memory_space<vmem>>, %arg6: memref<6x8x96xf32, #tpu.memory_space<vmem>>, %arg7: memref<6x8x128xf32, #tpu.memory_space<vmem>>, %arg8: memref<8x32xf32, #tpu.memory_space<vmem>>) attributes {dimension_semantics = [#tpu.dimension_semantics<arbitrary>], iteration_bounds = array<i64: 1>, scalar_prefetch = 0 : i64, scratch_operands = 1 : i64, tpu.core_type = #tpu.core_type<tc>, window_params = [{pipeline_mode = #tpu.pipeline_mode<synchronous>, transform_indices = @transform_0, window_bounds = array<i64: 8, 32>}, {pipeline_mode = #tpu.pipeline_mode<synchronous>, transform_indices = @transform_1, window_bounds = array<i64: 32, 32>}, {pipeline_mode = #tpu.pipeline_mode<synchronous>, transform_indices = @transform_2, window_bounds = array<i64: 32, 136>}, {pipeline_mode = #tpu.pipeline_mode<synchronous>, transform_indices = @transform_3, window_bounds = array<i64: 16, 128>}, {transform_indices = @transform_4, window_bounds = array<i64: 6, 8, 136>}, {transform_indices = @transform_5, window_bounds = array<i64: 6, 8, 96>}, {transform_indices = @transform_6, window_bounds = array<i64: 6, 8, 128>}]} {
    %c0_i32 = arith.constant 0 : i32
    %0 = arith.cmpi eq, %arg0, %c0_i32 : i32
    %1 = arith.extui %0 : i1 to i32
    %c0_i32_0 = arith.constant 0 : i32
    %2 = arith.cmpi ne, %1, %c0_i32_0 : i32
    scf.if %2 {
      %c0_118 = arith.constant 0 : index
      %c0_119 = arith.constant 0 : index
      %215 = vector.load %arg1[%c0_118, %c0_119] : memref<8x32xf32, #tpu.memory_space<vmem>>, vector<8x32xf32>
      %c0_120 = arith.constant 0 : index
      %c0_121 = arith.constant 0 : index
      %216 = vector.load %arg8[%c0_120, %c0_121] : memref<8x32xf32, #tpu.memory_space<vmem>>, vector<8x32xf32>
      tpu.vector_store %arg8[%c0_120, %c0_121], %215 {strides = array<i32>} : memref<8x32xf32, #tpu.memory_space<vmem>>, vector<8x32xf32>,
    } else {
    }
    %c0 = arith.constant 0 : index
    %c0_1 = arith.constant 0 : index
    %3 = vector.load %arg8[%c0, %c0_1] : memref<8x32xf32, #tpu.memory_space<vmem>>, vector<8x32xf32>
    %c0_i32_2 = arith.constant 0 : i32
    %4 = arith.index_cast %c0_i32_2 : i32 to index
    %c0_3 = arith.constant 0 : index
    %c0_4 = arith.constant 0 : index
    %5 = vector.load %arg5[%4, %c0_3, %c0_4] : memref<6x8x136xf32, #tpu.memory_space<vmem>>, vector<1x8x136xf32>
    %6 = vector.shape_cast %5 : vector<1x8x136xf32> to vector<8x136xf32>
    %c0_5 = arith.constant 0 : index
    %c0_6 = arith.constant 0 : index
    %7 = vector.load %arg2[%c0_5, %c0_6] : memref<32x32xf32, #tpu.memory_space<vmem>>, vector<32x32xf32>
    %cst = arith.constant dense<0.000000e+00> : vector<8x32xf32>
    %8 = tpu.matmul %3, %7, %cst {dimension_numbers = #tpu.dot_dimension_numbers<[1], [1], [0], [0], [0, 0, 1, 0], [], []>} : vector<8x32xf32>, vector<32x32xf32>, vector<8x32xf32> -> vector<8x32xf32>
    %c0_7 = arith.constant 0 : index
    %c0_8 = arith.constant 0 : index
    %9 = vector.load %arg3[%c0_7, %c0_8] : memref<32x136xf32, #tpu.memory_space<vmem>>, vector<32x136xf32>
    %cst_9 = arith.constant dense<0.000000e+00> : vector<8x32xf32>
    %10 = tpu.matmul %6, %9, %cst_9 {dimension_numbers = #tpu.dot_dimension_numbers<[1], [1], [0], [0], [0, 0, 1, 0], [], []>} : vector<8x136xf32>, vector<32x136xf32>, vector<8x32xf32> -> vector<8x32xf32>
    %11 = arith.addf %8, %10 : vector<8x32xf32>
    %12 = vector.extract_strided_slice %6 {offsets = [0, 0], sizes = [8, 128], strides = [1, 1]} : vector<8x136xf32> to vector<8x128xf32>
    %c0_10 = arith.constant 0 : index
    %c0_11 = arith.constant 0 : index
    %13 = vector.load %arg4[%c0_10, %c0_11] : memref<16x128xf32, #tpu.memory_space<vmem>>, vector<16x128xf32>
    %cst_12 = arith.constant dense<0.000000e+00> : vector<8x16xf32>
    %14 = tpu.matmul %12, %13, %cst_12 {dimension_numbers = #tpu.dot_dimension_numbers<[1], [1], [0], [0], [0, 0, 1, 0], [], []>} : vector<8x128xf32>, vector<16x128xf32>, vector<8x16xf32> -> vector<8x16xf32>
    %15 = arith.index_cast %c0_i32_2 : i32 to index
    %c0_13 = arith.constant 0 : index
    %c0_14 = arith.constant 0 : index
    %16 = vector.load %arg6[%15, %c0_13, %c0_14] : memref<6x8x96xf32, #tpu.memory_space<vmem>>, vector<1x8x96xf32>
    %17 = vector.shape_cast %16 : vector<1x8x96xf32> to vector<8x96xf32>
    %18 = vector.extract_strided_slice %17 {offsets = [0, 0], sizes = [8, 32], strides = [1, 1]} : vector<8x96xf32> to vector<8x32xf32>
    %19 = vector.extract_strided_slice %17 {offsets = [0, 32], sizes = [8, 32], strides = [1, 1]} : vector<8x96xf32> to vector<8x32xf32>
    %20 = vector.extract_strided_slice %17 {offsets = [0, 64], sizes = [8, 16], strides = [1, 1]} : vector<8x96xf32> to vector<8x16xf32>
    %21 = vector.extract_strided_slice %17 {offsets = [0, 80], sizes = [8, 16], strides = [1, 1]} : vector<8x96xf32> to vector<8x16xf32>
    %22 = arith.subf %18, %11 : vector<8x32xf32>
    %cst_15 = arith.constant 0.000000e+00 : f32
    %23 = vector.broadcast %cst_15 : f32 to vector<8x32xf32>
    %24 = arith.maximumf %22, %23 : vector<8x32xf32>
    %25 = arith.subf %11, %19 : vector<8x32xf32>
    %cst_16 = arith.constant 0.000000e+00 : f32
    %26 = vector.broadcast %cst_16 : f32 to vector<8x32xf32>
    %27 = arith.maximumf %25, %26 : vector<8x32xf32>
    %28 = arith.subf %20, %14 : vector<8x16xf32>
    %cst_17 = arith.constant 0.000000e+00 : f32
    %29 = vector.broadcast %cst_17 : f32 to vector<8x16xf32>
    %30 = arith.maximumf %28, %29 : vector<8x16xf32>
    %31 = arith.subf %14, %21 : vector<8x16xf32>
    %cst_18 = arith.constant 0.000000e+00 : f32
    %32 = vector.broadcast %cst_18 : f32 to vector<8x16xf32>
    %33 = arith.maximumf %31, %32 : vector<8x16xf32>
    %34 = tpu.concatenate %11, %24, %27, %30, %33 in 1 : vector<8x32xf32>, vector<8x32xf32>, vector<8x32xf32>, vector<8x16xf32>, vector<8x16xf32> -> vector<8x128xf32>
    %35 = arith.index_cast %c0_i32_2 : i32 to index
    %c0_19 = arith.constant 0 : index
    %c0_20 = arith.constant 0 : index
    %36 = vector.load %arg7[%35, %c0_19, %c0_20] : memref<6x8x128xf32, #tpu.memory_space<vmem>>, vector<1x8x128xf32>
    %37 = vector.shape_cast %36 : vector<1x8x128xf32> to vector<8x128xf32>
    %38 = vector.shape_cast %34 : vector<8x128xf32> to vector<1x8x128xf32>
    tpu.vector_store %arg7[%35, %c0_19, %c0_20], %38 {strides = array<i32>} : memref<6x8x128xf32, #tpu.memory_space<vmem>>, vector<1x8x128xf32>,
    %c1_i32 = arith.constant 1 : i32
    %39 = arith.index_cast %c1_i32 : i32 to index
    %c0_21 = arith.constant 0 : index
    %c0_22 = arith.constant 0 : index
    %40 = vector.load %arg5[%39, %c0_21, %c0_22] : memref<6x8x136xf32, #tpu.memory_space<vmem>>, vector<1x8x136xf32>
    %41 = vector.shape_cast %40 : vector<1x8x136xf32> to vector<8x136xf32>
    %c0_23 = arith.constant 0 : index
    %c0_24 = arith.constant 0 : index
    %42 = vector.load %arg2[%c0_23, %c0_24] : memref<32x32xf32, #tpu.memory_space<vmem>>, vector<32x32xf32>
    %cst_25 = arith.constant dense<0.000000e+00> : vector<8x32xf32>
    %43 = tpu.matmul %11, %42, %cst_25 {dimension_numbers = #tpu.dot_dimension_numbers<[1], [1], [0], [0], [0, 0, 1, 0], [], []>} : vector<8x32xf32>, vector<32x32xf32>, vector<8x32xf32> -> vector<8x32xf32>
    %c0_26 = arith.constant 0 : index
    %c0_27 = arith.constant 0 : index
    %44 = vector.load %arg3[%c0_26, %c0_27] : memref<32x136xf32, #tpu.memory_space<vmem>>, vector<32x136xf32>
    %cst_28 = arith.constant dense<0.000000e+00> : vector<8x32xf32>
    %45 = tpu.matmul %41, %44, %cst_28 {dimension_numbers = #tpu.dot_dimension_numbers<[1], [1], [0], [0], [0, 0, 1, 0], [], []>} : vector<8x136xf32>, vector<32x136xf32>, vector<8x32xf32> -> vector<8x32xf32>
    %46 = arith.addf %43, %45 : vector<8x32xf32>
    %47 = vector.extract_strided_slice %41 {offsets = [0, 0], sizes = [8, 128], strides = [1, 1]} : vector<8x136xf32> to vector<8x128xf32>
    %c0_29 = arith.constant 0 : index
    %c0_30 = arith.constant 0 : index
    %48 = vector.load %arg4[%c0_29, %c0_30] : memref<16x128xf32, #tpu.memory_space<vmem>>, vector<16x128xf32>
    %cst_31 = arith.constant dense<0.000000e+00> : vector<8x16xf32>
    %49 = tpu.matmul %47, %48, %cst_31 {dimension_numbers = #tpu.dot_dimension_numbers<[1], [1], [0], [0], [0, 0, 1, 0], [], []>} : vector<8x128xf32>, vector<16x128xf32>, vector<8x16xf32> -> vector<8x16xf32>
    %50 = arith.index_cast %c1_i32 : i32 to index
    %c0_32 = arith.constant 0 : index
    %c0_33 = arith.constant 0 : index
    %51 = vector.load %arg6[%50, %c0_32, %c0_33] : memref<6x8x96xf32, #tpu.memory_space<vmem>>, vector<1x8x96xf32>
    %52 = vector.shape_cast %51 : vector<1x8x96xf32> to vector<8x96xf32>
    %53 = vector.extract_strided_slice %52 {offsets = [0, 0], sizes = [8, 32], strides = [1, 1]} : vector<8x96xf32> to vector<8x32xf32>
    %54 = vector.extract_strided_slice %52 {offsets = [0, 32], sizes = [8, 32], strides = [1, 1]} : vector<8x96xf32> to vector<8x32xf32>
    %55 = vector.extract_strided_slice %52 {offsets = [0, 64], sizes = [8, 16], strides = [1, 1]} : vector<8x96xf32> to vector<8x16xf32>
    %56 = vector.extract_strided_slice %52 {offsets = [0, 80], sizes = [8, 16], strides = [1, 1]} : vector<8x96xf32> to vector<8x16xf32>
    %57 = arith.subf %53, %46 : vector<8x32xf32>
    %cst_34 = arith.constant 0.000000e+00 : f32
    %58 = vector.broadcast %cst_34 : f32 to vector<8x32xf32>
    %59 = arith.maximumf %57, %58 : vector<8x32xf32>
    %60 = arith.subf %46, %54 : vector<8x32xf32>
    %cst_35 = arith.constant 0.000000e+00 : f32
    %61 = vector.broadcast %cst_35 : f32 to vector<8x32xf32>
    %62 = arith.maximumf %60, %61 : vector<8x32xf32>
    %63 = arith.subf %55, %49 : vector<8x16xf32>
    %cst_36 = arith.constant 0.000000e+00 : f32
    %64 = vector.broadcast %cst_36 : f32 to vector<8x16xf32>
    %65 = arith.maximumf %63, %64 : vector<8x16xf32>
    %66 = arith.subf %49, %56 : vector<8x16xf32>
    %cst_37 = arith.constant 0.000000e+00 : f32
    %67 = vector.broadcast %cst_37 : f32 to vector<8x16xf32>
    %68 = arith.maximumf %66, %67 : vector<8x16xf32>
    %69 = tpu.concatenate %46, %59, %62, %65, %68 in 1 : vector<8x32xf32>, vector<8x32xf32>, vector<8x32xf32>, vector<8x16xf32>, vector<8x16xf32> -> vector<8x128xf32>
    %70 = arith.index_cast %c1_i32 : i32 to index
    %c0_38 = arith.constant 0 : index
    %c0_39 = arith.constant 0 : index
    %71 = vector.load %arg7[%70, %c0_38, %c0_39] : memref<6x8x128xf32, #tpu.memory_space<vmem>>, vector<1x8x128xf32>
    %72 = vector.shape_cast %71 : vector<1x8x128xf32> to vector<8x128xf32>
    %73 = vector.shape_cast %69 : vector<8x128xf32> to vector<1x8x128xf32>
    tpu.vector_store %arg7[%70, %c0_38, %c0_39], %73 {strides = array<i32>} : memref<6x8x128xf32, #tpu.memory_space<vmem>>, vector<1x8x128xf32>,
    %c2_i32 = arith.constant 2 : i32
    %74 = arith.index_cast %c2_i32 : i32 to index
    %c0_40 = arith.constant 0 : index
    %c0_41 = arith.constant 0 : index
    %75 = vector.load %arg5[%74, %c0_40, %c0_41] : memref<6x8x136xf32, #tpu.memory_space<vmem>>, vector<1x8x136xf32>
    %76 = vector.shape_cast %75 : vector<1x8x136xf32> to vector<8x136xf32>
    %c0_42 = arith.constant 0 : index
    %c0_43 = arith.constant 0 : index
    %77 = vector.load %arg2[%c0_42, %c0_43] : memref<32x32xf32, #tpu.memory_space<vmem>>, vector<32x32xf32>
    %cst_44 = arith.constant dense<0.000000e+00> : vector<8x32xf32>
    %78 = tpu.matmul %46, %77, %cst_44 {dimension_numbers = #tpu.dot_dimension_numbers<[1], [1], [0], [0], [0, 0, 1, 0], [], []>} : vector<8x32xf32>, vector<32x32xf32>, vector<8x32xf32> -> vector<8x32xf32>
    %c0_45 = arith.constant 0 : index
    %c0_46 = arith.constant 0 : index
    %79 = vector.load %arg3[%c0_45, %c0_46] : memref<32x136xf32, #tpu.memory_space<vmem>>, vector<32x136xf32>
    %cst_47 = arith.constant dense<0.000000e+00> : vector<8x32xf32>
    %80 = tpu.matmul %76, %79, %cst_47 {dimension_numbers = #tpu.dot_dimension_numbers<[1], [1], [0], [0], [0, 0, 1, 0], [], []>} : vector<8x136xf32>, vector<32x136xf32>, vector<8x32xf32> -> vector<8x32xf32>
    %81 = arith.addf %78, %80 : vector<8x32xf32>
    %82 = vector.extract_strided_slice %76 {offsets = [0, 0], sizes = [8, 128], strides = [1, 1]} : vector<8x136xf32> to vector<8x128xf32>
    %c0_48 = arith.constant 0 : index
    %c0_49 = arith.constant 0 : index
    %83 = vector.load %arg4[%c0_48, %c0_49] : memref<16x128xf32, #tpu.memory_space<vmem>>, vector<16x128xf32>
    %cst_50 = arith.constant dense<0.000000e+00> : vector<8x16xf32>
    %84 = tpu.matmul %82, %83, %cst_50 {dimension_numbers = #tpu.dot_dimension_numbers<[1], [1], [0], [0], [0, 0, 1, 0], [], []>} : vector<8x128xf32>, vector<16x128xf32>, vector<8x16xf32> -> vector<8x16xf32>
    %85 = arith.index_cast %c2_i32 : i32 to index
    %c0_51 = arith.constant 0 : index
    %c0_52 = arith.constant 0 : index
    %86 = vector.load %arg6[%85, %c0_51, %c0_52] : memref<6x8x96xf32, #tpu.memory_space<vmem>>, vector<1x8x96xf32>
    %87 = vector.shape_cast %86 : vector<1x8x96xf32> to vector<8x96xf32>
    %88 = vector.extract_strided_slice %87 {offsets = [0, 0], sizes = [8, 32], strides = [1, 1]} : vector<8x96xf32> to vector<8x32xf32>
    %89 = vector.extract_strided_slice %87 {offsets = [0, 32], sizes = [8, 32], strides = [1, 1]} : vector<8x96xf32> to vector<8x32xf32>
    %90 = vector.extract_strided_slice %87 {offsets = [0, 64], sizes = [8, 16], strides = [1, 1]} : vector<8x96xf32> to vector<8x16xf32>
    %91 = vector.extract_strided_slice %87 {offsets = [0, 80], sizes = [8, 16], strides = [1, 1]} : vector<8x96xf32> to vector<8x16xf32>
    %92 = arith.subf %88, %81 : vector<8x32xf32>
    %cst_53 = arith.constant 0.000000e+00 : f32
    %93 = vector.broadcast %cst_53 : f32 to vector<8x32xf32>
    %94 = arith.maximumf %92, %93 : vector<8x32xf32>
    %95 = arith.subf %81, %89 : vector<8x32xf32>
    %cst_54 = arith.constant 0.000000e+00 : f32
    %96 = vector.broadcast %cst_54 : f32 to vector<8x32xf32>
    %97 = arith.maximumf %95, %96 : vector<8x32xf32>
    %98 = arith.subf %90, %84 : vector<8x16xf32>
    %cst_55 = arith.constant 0.000000e+00 : f32
    %99 = vector.broadcast %cst_55 : f32 to vector<8x16xf32>
    %100 = arith.maximumf %98, %99 : vector<8x16xf32>
    %101 = arith.subf %84, %91 : vector<8x16xf32>
    %cst_56 = arith.constant 0.000000e+00 : f32
    %102 = vector.broadcast %cst_56 : f32 to vector<8x16xf32>
    %103 = arith.maximumf %101, %102 : vector<8x16xf32>
    %104 = tpu.concatenate %81, %94, %97, %100, %103 in 1 : vector<8x32xf32>, vector<8x32xf32>, vector<8x32xf32>, vector<8x16xf32>, vector<8x16xf32> -> vector<8x128xf32>
    %105 = arith.index_cast %c2_i32 : i32 to index
    %c0_57 = arith.constant 0 : index
    %c0_58 = arith.constant 0 : index
    %106 = vector.load %arg7[%105, %c0_57, %c0_58] : memref<6x8x128xf32, #tpu.memory_space<vmem>>, vector<1x8x128xf32>
    %107 = vector.shape_cast %106 : vector<1x8x128xf32> to vector<8x128xf32>
    %108 = vector.shape_cast %104 : vector<8x128xf32> to vector<1x8x128xf32>
    tpu.vector_store %arg7[%105, %c0_57, %c0_58], %108 {strides = array<i32>} : memref<6x8x128xf32, #tpu.memory_space<vmem>>, vector<1x8x128xf32>,
    %c3_i32 = arith.constant 3 : i32
    %109 = arith.index_cast %c3_i32 : i32 to index
    %c0_59 = arith.constant 0 : index
    %c0_60 = arith.constant 0 : index
    %110 = vector.load %arg5[%109, %c0_59, %c0_60] : memref<6x8x136xf32, #tpu.memory_space<vmem>>, vector<1x8x136xf32>
    %111 = vector.shape_cast %110 : vector<1x8x136xf32> to vector<8x136xf32>
    %c0_61 = arith.constant 0 : index
    %c0_62 = arith.constant 0 : index
    %112 = vector.load %arg2[%c0_61, %c0_62] : memref<32x32xf32, #tpu.memory_space<vmem>>, vector<32x32xf32>
    %cst_63 = arith.constant dense<0.000000e+00> : vector<8x32xf32>
    %113 = tpu.matmul %81, %112, %cst_63 {dimension_numbers = #tpu.dot_dimension_numbers<[1], [1], [0], [0], [0, 0, 1, 0], [], []>} : vector<8x32xf32>, vector<32x32xf32>, vector<8x32xf32> -> vector<8x32xf32>
    %c0_64 = arith.constant 0 : index
    %c0_65 = arith.constant 0 : index
    %114 = vector.load %arg3[%c0_64, %c0_65] : memref<32x136xf32, #tpu.memory_space<vmem>>, vector<32x136xf32>
    %cst_66 = arith.constant dense<0.000000e+00> : vector<8x32xf32>
    %115 = tpu.matmul %111, %114, %cst_66 {dimension_numbers = #tpu.dot_dimension_numbers<[1], [1], [0], [0], [0, 0, 1, 0], [], []>} : vector<8x136xf32>, vector<32x136xf32>, vector<8x32xf32> -> vector<8x32xf32>
    %116 = arith.addf %113, %115 : vector<8x32xf32>
    %117 = vector.extract_strided_slice %111 {offsets = [0, 0], sizes = [8, 128], strides = [1, 1]} : vector<8x136xf32> to vector<8x128xf32>
    %c0_67 = arith.constant 0 : index
    %c0_68 = arith.constant 0 : index
    %118 = vector.load %arg4[%c0_67, %c0_68] : memref<16x128xf32, #tpu.memory_space<vmem>>, vector<16x128xf32>
    %cst_69 = arith.constant dense<0.000000e+00> : vector<8x16xf32>
    %119 = tpu.matmul %117, %118, %cst_69 {dimension_numbers = #tpu.dot_dimension_numbers<[1], [1], [0], [0], [0, 0, 1, 0], [], []>} : vector<8x128xf32>, vector<16x128xf32>, vector<8x16xf32> -> vector<8x16xf32>
    %120 = arith.index_cast %c3_i32 : i32 to index
    %c0_70 = arith.constant 0 : index
    %c0_71 = arith.constant 0 : index
    %121 = vector.load %arg6[%120, %c0_70, %c0_71] : memref<6x8x96xf32, #tpu.memory_space<vmem>>, vector<1x8x96xf32>
    %122 = vector.shape_cast %121 : vector<1x8x96xf32> to vector<8x96xf32>
    %123 = vector.extract_strided_slice %122 {offsets = [0, 0], sizes = [8, 32], strides = [1, 1]} : vector<8x96xf32> to vector<8x32xf32>
    %124 = vector.extract_strided_slice %122 {offsets = [0, 32], sizes = [8, 32], strides = [1, 1]} : vector<8x96xf32> to vector<8x32xf32>
    %125 = vector.extract_strided_slice %122 {offsets = [0, 64], sizes = [8, 16], strides = [1, 1]} : vector<8x96xf32> to vector<8x16xf32>
    %126 = vector.extract_strided_slice %122 {offsets = [0, 80], sizes = [8, 16], strides = [1, 1]} : vector<8x96xf32> to vector<8x16xf32>
    %127 = arith.subf %123, %116 : vector<8x32xf32>
    %cst_72 = arith.constant 0.000000e+00 : f32
    %128 = vector.broadcast %cst_72 : f32 to vector<8x32xf32>
    %129 = arith.maximumf %127, %128 : vector<8x32xf32>
    %130 = arith.subf %116, %124 : vector<8x32xf32>
    %cst_73 = arith.constant 0.000000e+00 : f32
    %131 = vector.broadcast %cst_73 : f32 to vector<8x32xf32>
    %132 = arith.maximumf %130, %131 : vector<8x32xf32>
    %133 = arith.subf %125, %119 : vector<8x16xf32>
    %cst_74 = arith.constant 0.000000e+00 : f32
    %134 = vector.broadcast %cst_74 : f32 to vector<8x16xf32>
    %135 = arith.maximumf %133, %134 : vector<8x16xf32>
    %136 = arith.subf %119, %126 : vector<8x16xf32>
    %cst_75 = arith.constant 0.000000e+00 : f32
    %137 = vector.broadcast %cst_75 : f32 to vector<8x16xf32>
    %138 = arith.maximumf %136, %137 : vector<8x16xf32>
    %139 = tpu.concatenate %116, %129, %132, %135, %138 in 1 : vector<8x32xf32>, vector<8x32xf32>, vector<8x32xf32>, vector<8x16xf32>, vector<8x16xf32> -> vector<8x128xf32>
    %140 = arith.index_cast %c3_i32 : i32 to index
    %c0_76 = arith.constant 0 : index
    %c0_77 = arith.constant 0 : index
    %141 = vector.load %arg7[%140, %c0_76, %c0_77] : memref<6x8x128xf32, #tpu.memory_space<vmem>>, vector<1x8x128xf32>
    %142 = vector.shape_cast %141 : vector<1x8x128xf32> to vector<8x128xf32>
    %143 = vector.shape_cast %139 : vector<8x128xf32> to vector<1x8x128xf32>
    tpu.vector_store %arg7[%140, %c0_76, %c0_77], %143 {strides = array<i32>} : memref<6x8x128xf32, #tpu.memory_space<vmem>>, vector<1x8x128xf32>,
    %c4_i32 = arith.constant 4 : i32
    %144 = arith.index_cast %c4_i32 : i32 to index
    %c0_78 = arith.constant 0 : index
    %c0_79 = arith.constant 0 : index
    %145 = vector.load %arg5[%144, %c0_78, %c0_79] : memref<6x8x136xf32, #tpu.memory_space<vmem>>, vector<1x8x136xf32>
    %146 = vector.shape_cast %145 : vector<1x8x136xf32> to vector<8x136xf32>
    %c0_80 = arith.constant 0 : index
    %c0_81 = arith.constant 0 : index
    %147 = vector.load %arg2[%c0_80, %c0_81] : memref<32x32xf32, #tpu.memory_space<vmem>>, vector<32x32xf32>
    %cst_82 = arith.constant dense<0.000000e+00> : vector<8x32xf32>
    %148 = tpu.matmul %116, %147, %cst_82 {dimension_numbers = #tpu.dot_dimension_numbers<[1], [1], [0], [0], [0, 0, 1, 0], [], []>} : vector<8x32xf32>, vector<32x32xf32>, vector<8x32xf32> -> vector<8x32xf32>
    %c0_83 = arith.constant 0 : index
    %c0_84 = arith.constant 0 : index
    %149 = vector.load %arg3[%c0_83, %c0_84] : memref<32x136xf32, #tpu.memory_space<vmem>>, vector<32x136xf32>
    %cst_85 = arith.constant dense<0.000000e+00> : vector<8x32xf32>
    %150 = tpu.matmul %146, %149, %cst_85 {dimension_numbers = #tpu.dot_dimension_numbers<[1], [1], [0], [0], [0, 0, 1, 0], [], []>} : vector<8x136xf32>, vector<32x136xf32>, vector<8x32xf32> -> vector<8x32xf32>
    %151 = arith.addf %148, %150 : vector<8x32xf32>
    %152 = vector.extract_strided_slice %146 {offsets = [0, 0], sizes = [8, 128], strides = [1, 1]} : vector<8x136xf32> to vector<8x128xf32>
    %c0_86 = arith.constant 0 : index
    %c0_87 = arith.constant 0 : index
    %153 = vector.load %arg4[%c0_86, %c0_87] : memref<16x128xf32, #tpu.memory_space<vmem>>, vector<16x128xf32>
    %cst_88 = arith.constant dense<0.000000e+00> : vector<8x16xf32>
    %154 = tpu.matmul %152, %153, %cst_88 {dimension_numbers = #tpu.dot_dimension_numbers<[1], [1], [0], [0], [0, 0, 1, 0], [], []>} : vector<8x128xf32>, vector<16x128xf32>, vector<8x16xf32> -> vector<8x16xf32>
    %155 = arith.index_cast %c4_i32 : i32 to index
    %c0_89 = arith.constant 0 : index
    %c0_90 = arith.constant 0 : index
    %156 = vector.load %arg6[%155, %c0_89, %c0_90] : memref<6x8x96xf32, #tpu.memory_space<vmem>>, vector<1x8x96xf32>
    %157 = vector.shape_cast %156 : vector<1x8x96xf32> to vector<8x96xf32>
    %158 = vector.extract_strided_slice %157 {offsets = [0, 0], sizes = [8, 32], strides = [1, 1]} : vector<8x96xf32> to vector<8x32xf32>
    %159 = vector.extract_strided_slice %157 {offsets = [0, 32], sizes = [8, 32], strides = [1, 1]} : vector<8x96xf32> to vector<8x32xf32>
    %160 = vector.extract_strided_slice %157 {offsets = [0, 64], sizes = [8, 16], strides = [1, 1]} : vector<8x96xf32> to vector<8x16xf32>
    %161 = vector.extract_strided_slice %157 {offsets = [0, 80], sizes = [8, 16], strides = [1, 1]} : vector<8x96xf32> to vector<8x16xf32>
    %162 = arith.subf %158, %151 : vector<8x32xf32>
    %cst_91 = arith.constant 0.000000e+00 : f32
    %163 = vector.broadcast %cst_91 : f32 to vector<8x32xf32>
    %164 = arith.maximumf %162, %163 : vector<8x32xf32>
    %165 = arith.subf %151, %159 : vector<8x32xf32>
    %cst_92 = arith.constant 0.000000e+00 : f32
    %166 = vector.broadcast %cst_92 : f32 to vector<8x32xf32>
    %167 = arith.maximumf %165, %166 : vector<8x32xf32>
    %168 = arith.subf %160, %154 : vector<8x16xf32>
    %cst_93 = arith.constant 0.000000e+00 : f32
    %169 = vector.broadcast %cst_93 : f32 to vector<8x16xf32>
    %170 = arith.maximumf %168, %169 : vector<8x16xf32>
    %171 = arith.subf %154, %161 : vector<8x16xf32>
    %cst_94 = arith.constant 0.000000e+00 : f32
    %172 = vector.broadcast %cst_94 : f32 to vector<8x16xf32>
    %173 = arith.maximumf %171, %172 : vector<8x16xf32>
    %174 = tpu.concatenate %151, %164, %167, %170, %173 in 1 : vector<8x32xf32>, vector<8x32xf32>, vector<8x32xf32>, vector<8x16xf32>, vector<8x16xf32> -> vector<8x128xf32>
    %175 = arith.index_cast %c4_i32 : i32 to index
    %c0_95 = arith.constant 0 : index
    %c0_96 = arith.constant 0 : index
    %176 = vector.load %arg7[%175, %c0_95, %c0_96] : memref<6x8x128xf32, #tpu.memory_space<vmem>>, vector<1x8x128xf32>
    %177 = vector.shape_cast %176 : vector<1x8x128xf32> to vector<8x128xf32>
    %178 = vector.shape_cast %174 : vector<8x128xf32> to vector<1x8x128xf32>
    tpu.vector_store %arg7[%175, %c0_95, %c0_96], %178 {strides = array<i32>} : memref<6x8x128xf32, #tpu.memory_space<vmem>>, vector<1x8x128xf32>,
    %c5_i32 = arith.constant 5 : i32
    %179 = arith.index_cast %c5_i32 : i32 to index
    %c0_97 = arith.constant 0 : index
    %c0_98 = arith.constant 0 : index
    %180 = vector.load %arg5[%179, %c0_97, %c0_98] : memref<6x8x136xf32, #tpu.memory_space<vmem>>, vector<1x8x136xf32>
    %181 = vector.shape_cast %180 : vector<1x8x136xf32> to vector<8x136xf32>
    %c0_99 = arith.constant 0 : index
    %c0_100 = arith.constant 0 : index
    %182 = vector.load %arg2[%c0_99, %c0_100] : memref<32x32xf32, #tpu.memory_space<vmem>>, vector<32x32xf32>
    %cst_101 = arith.constant dense<0.000000e+00> : vector<8x32xf32>
    %183 = tpu.matmul %151, %182, %cst_101 {dimension_numbers = #tpu.dot_dimension_numbers<[1], [1], [0], [0], [0, 0, 1, 0], [], []>} : vector<8x32xf32>, vector<32x32xf32>, vector<8x32xf32> -> vector<8x32xf32>
    %c0_102 = arith.constant 0 : index
    %c0_103 = arith.constant 0 : index
    %184 = vector.load %arg3[%c0_102, %c0_103] : memref<32x136xf32, #tpu.memory_space<vmem>>, vector<32x136xf32>
    %cst_104 = arith.constant dense<0.000000e+00> : vector<8x32xf32>
    %185 = tpu.matmul %181, %184, %cst_104 {dimension_numbers = #tpu.dot_dimension_numbers<[1], [1], [0], [0], [0, 0, 1, 0], [], []>} : vector<8x136xf32>, vector<32x136xf32>, vector<8x32xf32> -> vector<8x32xf32>
    %186 = arith.addf %183, %185 : vector<8x32xf32>
    %187 = vector.extract_strided_slice %181 {offsets = [0, 0], sizes = [8, 128], strides = [1, 1]} : vector<8x136xf32> to vector<8x128xf32>
    %c0_105 = arith.constant 0 : index
    %c0_106 = arith.constant 0 : index
    %188 = vector.load %arg4[%c0_105, %c0_106] : memref<16x128xf32, #tpu.memory_space<vmem>>, vector<16x128xf32>
    %cst_107 = arith.constant dense<0.000000e+00> : vector<8x16xf32>
    %189 = tpu.matmul %187, %188, %cst_107 {dimension_numbers = #tpu.dot_dimension_numbers<[1], [1], [0], [0], [0, 0, 1, 0], [], []>} : vector<8x128xf32>, vector<16x128xf32>, vector<8x16xf32> -> vector<8x16xf32>
    %190 = arith.index_cast %c5_i32 : i32 to index
    %c0_108 = arith.constant 0 : index
    %c0_109 = arith.constant 0 : index
    %191 = vector.load %arg6[%190, %c0_108, %c0_109] : memref<6x8x96xf32, #tpu.memory_space<vmem>>, vector<1x8x96xf32>
    %192 = vector.shape_cast %191 : vector<1x8x96xf32> to vector<8x96xf32>
    %193 = vector.extract_strided_slice %192 {offsets = [0, 0], sizes = [8, 32], strides = [1, 1]} : vector<8x96xf32> to vector<8x32xf32>
    %194 = vector.extract_strided_slice %192 {offsets = [0, 32], sizes = [8, 32], strides = [1, 1]} : vector<8x96xf32> to vector<8x32xf32>
    %195 = vector.extract_strided_slice %192 {offsets = [0, 64], sizes = [8, 16], strides = [1, 1]} : vector<8x96xf32> to vector<8x16xf32>
    %196 = vector.extract_strided_slice %192 {offsets = [0, 80], sizes = [8, 16], strides = [1, 1]} : vector<8x96xf32> to vector<8x16xf32>
    %197 = arith.subf %193, %186 : vector<8x32xf32>
    %cst_110 = arith.constant 0.000000e+00 : f32
    %198 = vector.broadcast %cst_110 : f32 to vector<8x32xf32>
    %199 = arith.maximumf %197, %198 : vector<8x32xf32>
    %200 = arith.subf %186, %194 : vector<8x32xf32>
    %cst_111 = arith.constant 0.000000e+00 : f32
    %201 = vector.broadcast %cst_111 : f32 to vector<8x32xf32>
    %202 = arith.maximumf %200, %201 : vector<8x32xf32>
    %203 = arith.subf %195, %189 : vector<8x16xf32>
    %cst_112 = arith.constant 0.000000e+00 : f32
    %204 = vector.broadcast %cst_112 : f32 to vector<8x16xf32>
    %205 = arith.maximumf %203, %204 : vector<8x16xf32>
    %206 = arith.subf %189, %196 : vector<8x16xf32>
    %cst_113 = arith.constant 0.000000e+00 : f32
    %207 = vector.broadcast %cst_113 : f32 to vector<8x16xf32>
    %208 = arith.maximumf %206, %207 : vector<8x16xf32>
    %209 = tpu.concatenate %186, %199, %202, %205, %208 in 1 : vector<8x32xf32>, vector<8x32xf32>, vector<8x32xf32>, vector<8x16xf32>, vector<8x16xf32> -> vector<8x128xf32>
    %210 = arith.index_cast %c5_i32 : i32 to index
    %c0_114 = arith.constant 0 : index
    %c0_115 = arith.constant 0 : index
    %211 = vector.load %arg7[%210, %c0_114, %c0_115] : memref<6x8x128xf32, #tpu.memory_space<vmem>>, vector<1x8x128xf32>
    %212 = vector.shape_cast %211 : vector<1x8x128xf32> to vector<8x128xf32>
    %213 = vector.shape_cast %209 : vector<8x128xf32> to vector<1x8x128xf32>
    tpu.vector_store %arg7[%210, %c0_114, %c0_115], %213 {strides = array<i32>} : memref<6x8x128xf32, #tpu.memory_space<vmem>>, vector<1x8x128xf32>,
    %c6_i32 = arith.constant 6 : i32
    %c0_116 = arith.constant 0 : index
    %c0_117 = arith.constant 0 : index
    %214 = vector.load %arg8[%c0_116, %c0_117] : memref<8x32xf32, #tpu.memory_space<vmem>>, vector<8x32xf32>
    tpu.vector_store %arg8[%c0_116, %c0_117], %186 {strides = array<i32>} : memref<8x32xf32, #tpu.memory_space<vmem>>, vector<8x32xf32>,
    return
  }
  func.func @transform_0(%arg0: i32) -> (i32, i32) {
    %c0_i32 = arith.constant 0 : i32
    %c0_i32_0 = arith.constant 0 : i32
    %c0_i32_1 = arith.constant 0 : i32
    return %c0_i32, %c0_i32_0 : i32, i32
  }
  func.func @transform_1(%arg0: i32) -> (i32, i32) {
    %c0_i32 = arith.constant 0 : i32
    %c0_i32_0 = arith.constant 0 : i32
    %c0_i32_1 = arith.constant 0 : i32
    return %c0_i32, %c0_i32_0 : i32, i32
  }
  func.func @transform_2(%arg0: i32) -> (i32, i32) {
    %c0_i32 = arith.constant 0 : i32
    %c0_i32_0 = arith.constant 0 : i32
    %c0_i32_1 = arith.constant 0 : i32
    return %c0_i32, %c0_i32_0 : i32, i32
  }
  func.func @transform_3(%arg0: i32) -> (i32, i32) {
    %c0_i32 = arith.constant 0 : i32
    %c0_i32_0 = arith.constant 0 : i32
    %c0_i32_1 = arith.constant 0 : i32
    return %c0_i32, %c0_i32_0 : i32, i32
  }
  func.func @transform_4(%arg0: i32) -> (i32, i32, i32) {
    %c0_i32 = arith.constant 0 : i32
    %c0_i32_0 = arith.constant 0 : i32
    %c0_i32_1 = arith.constant 0 : i32
    return %arg0, %c0_i32, %c0_i32_0 : i32, i32, i32
  }
  func.func @transform_5(%arg0: i32) -> (i32, i32, i32) {
    %c0_i32 = arith.constant 0 : i32
    %c0_i32_0 = arith.constant 0 : i32
    %c0_i32_1 = arith.constant 0 : i32
    return %arg0, %c0_i32, %c0_i32_0 : i32, i32, i32
  }
  func.func @transform_6(%arg0: i32) -> (i32, i32, i32) {
    %c0_i32 = arith.constant 0 : i32
    %c0_i32_0 = arith.constant 0 : i32
    %c0_i32_1 = arith.constant 0 : i32
    return %arg0, %c0_i32, %c0_i32_0 : i32, i32, i32
  }
}

</mosaic_0001>

<bundles_post_ra>
// kernel: tpu_custom_call.1
= control target key start
LH: loop header
LB: loop body
LE: loop exit
PB: predicated region body
PF: predicated region fallthrough
CT: control target
= control target key end

     0   :  { %11 = vsyncpa [#allocation4], 0  ;;  %s2801_s0 = inlined_call_operand.hbm [shape: f32[8,32], index: 0, kind: input, shape index: {}]   ;;  %s2802_s1 = inlined_call_operand.hbm [shape: f32[32,32], index: 1, kind: input, shape index: {}]   ;;  %s2803_s2 = inlined_call_operand.hbm [shape: f32[32,136], index: 2, kind: input, shape index: {}]   ;;  %s2804_s3 = inlined_call_operand.hbm [shape: f32[16,128], index: 3, kind: input, shape index: {}]   ;;  %s2805_s4 = inlined_call_operand.hbm [shape: f32[6,8,136], index: 4, kind: input, shape index: {}]   ;;  %s2806_s5 = inlined_call_operand.hbm [shape: f32[6,8,96], index: 5, kind: input, shape index: {}]   ;;  %s2807_s6 = inlined_call_operand.hbm [shape: f32[6,8,128], index: 6, kind: output, shape index: {}]  }
   0x1   :  { %12 = vsyncpa [#allocation7], 0 }
   0x2   :  { %13 = vsyncpa [#allocation10], 0 }
   0x3   :  { %14 = vsyncpa [#allocation13], 0 }
   0x4   :  { %15 = vsyncpa [#allocation5], 0  ;;  %s2319_s21 = smov [#allocation6]  }
   0x5   :  { %s31_s22 = sshll.u32 %s2319_s21, 4  ;;  %s32_s22 = int_to_ptr.vmem [resolvable:$true] %s31_s22 }
   0x6   :  { %s2177_s23 = scalar_lea.vmem %s32_s22, 512  ;;  %p2182_p1 = scmp.lt.s32.totalorder %s32_s22, %s32_s22 }
   0x7   :  { %p2178_p0 = scmp.ne.s32.totalorder %s32_s22, %s2177_s23  ;;  %p2183_p2 = scmp.lt.s32.totalorder %s2177_s23, %s2177_s23 }
   0x9   :  { %p2184_p3 = por %p2183_p2, %p2182_p1 }
   0xb   :  { %p2185_p4 = pnand %p2184_p3, %p2178_p0 }
   0xd   :  { %2188 = shalt.err (!%p2185_p4)
}
   0xe   :  { %s2320_s24 = smov 128   ;;  %s2321_s25 = smov 8  }
   0xf   :  { %37 = dma.hbm_to_vmem [thread:$0]  %s2802_s1, 512, %s32_s22, [#allocation7], %s2320_s24, %s2320_s24, %s2321_s25  }
  0x10   :  { %s2322_s28 = smov [#allocation9]   ;;  %s2323_s30 = smov [#allocation3]  }
  0x11   :  { %s55_s29 = sshll.u32 %s2322_s28, 4  ;;  %s22_s7 = sshll.u32 %s2323_s30, 4  ;;  %s56_s29 = int_to_ptr.vmem [resolvable:$true] %s55_s29  ;;  %s23_s7 = int_to_ptr.vmem [resolvable:$true] %s22_s7 }
  0x12   :  { %s2197_s8 = scalar_lea.vmem %s56_s29, 256  ;;  %p2202_p6 = scmp.lt.s32.totalorder %s56_s29, %s56_s29 }
  0x13   :  { %p2198_p5 = scmp.ne.s32.totalorder %s56_s29, %s2197_s8  ;;  %p2203_p7 = scmp.lt.s32.totalorder %s2197_s8, %s2197_s8 }
  0x15   :  { %p2204_p8 = por %p2203_p7, %p2202_p6 }
  0x17   :  { %p2205_p9 = pnand %p2204_p8, %p2198_p5 }
  0x19   :  { %2208 = shalt.err (!%p2205_p9)
}
  0x1a   :  { %61 = dma.hbm_to_vmem [thread:$0]  %s2804_s3, 256, %s56_s29, [#allocation10], %s2320_s24, %s2320_s24, %s2321_s25  }
  0x1b   :  { %s2217_s1 = scalar_lea.vmem %s23_s7, 128  ;;  %p2222_p11 = scmp.lt.s32.totalorder %s23_s7, %s23_s7 }
  0x1c   :  { %p2218_p10 = scmp.ne.s32.totalorder %s23_s7, %s2217_s1  ;;  %p2223_p12 = scmp.lt.s32.totalorder %s2217_s1, %s2217_s1 }
  0x1e   :  { %p2224_p13 = por %p2223_p12, %p2222_p11 }
  0x20   :  { %p2225_p0 = pnand %p2224_p13, %p2218_p10 }
  0x22   :  { %2228 = shalt.err (!%p2225_p0)
}
  0x23   :  { %25 = dma.hbm_to_vmem [thread:$0]  %s2801_s0, 128, %s23_s7, [#allocation4]  }
  0x24   :  { %s2324_s13 = smov [#allocation8]  }
  0x25   :  { %s43_s14 = sshll.u32 %s2324_s13, 4  ;;  %s44_s14 = int_to_ptr.vmem [resolvable:$true] %s43_s14 }
  0x26   :  { %s2237_s15 = scalar_lea.vmem %s44_s14, 1024  ;;  %p2242_p2 = scmp.lt.s32.totalorder %s44_s14, %s44_s14 }
  0x27   :  { %p2238_p1 = scmp.ne.s32.totalorder %s44_s14, %s2237_s15  ;;  %p2243_p3 = scmp.lt.s32.totalorder %s2237_s15, %s2237_s15 }
  0x29   :  { %p2244_p4 = por %p2243_p3, %p2242_p2 }
  0x2b   :  { %p2245_p5 = pnand %p2244_p4, %p2238_p1 }
  0x2d   :  { %2248 = shalt.err (!%p2245_p5)
}
  0x2e   :  { %s2325_s3 = smov 256   ;;  %s2326_s16 = smov 16  }
  0x2f   :  { %49 = dma.hbm_to_vmem [thread:$0]  %s2803_s2, 1024, %s44_s14, [#allocation7], %s2325_s3, %s2325_s3, %s2326_s16  }
  0x30   :  { %s2327_s19 = smov [#allocation11]   ;;  %s2328_s21 = smov [#allocation12]  }
  0x31   :  { %s67_s20 = sshll.u32 %s2327_s19, 4  ;;  %s79_s0 = sshll.u32 %s2328_s21, 4  ;;  %s68_s20 = int_to_ptr.vmem [resolvable:$true] %s67_s20  ;;  %s80_s0 = int_to_ptr.vmem [resolvable:$true] %s79_s0 }
  0x32   :  { %s2257_s22 = scalar_lea.vmem %s68_s20, 1536  ;;  %p2262_p7 = scmp.lt.s32.totalorder %s68_s20, %s68_s20 }
  0x33   :  { %p2258_p6 = scmp.ne.s32.totalorder %s68_s20, %s2257_s22  ;;  %p2263_p8 = scmp.lt.s32.totalorder %s2257_s22, %s2257_s22 }
  0x35   :  { %p2264_p9 = por %p2263_p8, %p2262_p7 }
  0x37   :  { %p2265_p10 = pnand %p2264_p9, %p2258_p6 }
  0x39   :  { %2268 = shalt.err (!%p2265_p10)
}
  0x3a   :  { %73 = dma.hbm_to_vmem [thread:$0]  %s2805_s4, 1536, %s68_s20, [#allocation10], %s2325_s3, %s2325_s3, %s2326_s16  }
  0x3b   :  { %s2277_s27 = scalar_lea.vmem %s80_s0, 768  ;;  %p2282_p12 = scmp.lt.s32.totalorder %s80_s0, %s80_s0 }
  0x3c   :  { %p2278_p11 = scmp.ne.s32.totalorder %s80_s0, %s2277_s27  ;;  %p2283_p13 = scmp.lt.s32.totalorder %s2277_s27, %s2277_s27 }
  0x3e   :  { %p2284_p0 = por %p2283_p13, %p2282_p12 }
  0x40   :  { %p2285_p1 = pnand %p2284_p0, %p2278_p11 }
  0x42   :  { %2288 = shalt.err (!%p2285_p1)
}
  0x43   :  { %85 = dma.hbm_to_vmem [thread:$0]  %s2806_s5, 768, %s80_s0, [#allocation13], %s2320_s24, %s2320_s24, %s2321_s25  }
  0x44   :  { %2309 = dma.done.wait [#allocation4], 128  }
  0x45   :  { %2310 = vsyncadd [#allocation4], 4294967168 }
  0x46   :  { %2311 = dma.done.wait [#allocation7], 1536  }
  0x47   :  { %2312 = vsyncadd [#allocation7], 4294965760 }
  0x48   :  { %2313 = dma.done.wait [#allocation10], 1792  }
  0x49   :  { %2314 = vsyncadd [#allocation10], 4294965504 }
  0x4a   :  { %2315 = dma.done.wait [#allocation13], 768  }
  0x4b   :  { %2316 = vsyncadd [#allocation13], 4294966528  ;;  %v2329_v0 = vmov 0.0   ;;  %vm2330_vm0 = vmmov 0   ;;  %vm126_vm1 = vcmask 64512   ;;  %vm109_vm2 = vcmask 261120  }
  0x4c   :  { %2043 = vmatprep.subr.mxu1 %v2329_v0  ;;  %2051 = vmatprep.mubr.msk.f32.mxu1 %vm2330_vm0, %v2329_v0  ;;  %v2402_v1 = vld [vmem:[#allocation8 + $0x38] sm:$0xff]  ;;  %v2406_v3 = vld [vmem:[#allocation8 + $0x30] sm:$0xff]  ;;  %v2412_v4 = vld [vmem:[#allocation8 + $0x28] sm:$0xff]  ;;  %s2331_s4 = smov 96   ;;  %s2332_s5 = smov 48   ;;  %vm407_vm3 = vcmask 523264  }
  0x4d   :  { %v2404_v2 = vld [vmem:[#allocation6 + $0x18] sm:$0xff]  ;;  %1935 = vmatprep.subr.msk.mxu0 %vm126_vm1, %v2402_v1  ;;  %v2416_v5 = vld [vmem:[#allocation6 + $0x10] sm:$0xff]  ;;  %v2420_v6 = vld [vmem:[#allocation8 + $0x20] sm:$0xff]  ;;  %s2333_s29 = smov 64   ;;  %s2334_s30 = smov 32   ;;  %vm409_vm4 = vcmask 785408  }
  0x4e   :  { %2044 = vmatpush3.xpose.msk.msra.mxu1 %vm109_vm2, %v2404_v2  ;;  %167 = vmatpush1.xpose.msra.mxu0 %v2406_v3  ;;  %v2422_v7 = vld [vmem:[#allocation8 + $0x18] sm:$0xff]  ;;  %v2428_v10 = vld [vmem:[#allocation12] sm:$0xff]  ;;  %v2432_v11 = vld [vmem:[#allocation6 + $0x8] sm:$0xff]  ;;  %s2335_s7 = smov 112   ;;  %vm411_vm5 = vcmask 916480   ;;  %s2336_s8 = smov [#allocation14]  }
  0x4f   :  { %2045 = vmatprep.subr.mxu1 %v2329_v0  ;;  %1936 = vmatprep.subr.msk.mxu0 %vm126_vm1, %v2412_v4  ;;  %v113_v8 = vld [vmem:[#allocation11 + $0x8] sm:$0xff]  ;;  %v2436_v12 = vld [vmem:[#allocation8 + $0x10] sm:$0xff]  ;;  %v2440_v13 = vld [vmem:[#allocation8 + $0x8] sm:$0xff]  ;;  %s1920_s9 = sshll.u32 %s2336_s8, 4  ;;  %s1921_s9 = int_to_ptr.vmem [resolvable:$true] %s1920_s9 }
  0x50   :  { %v108_v9 = vld [vmem:[#allocation3] sm:$0xff]  ;;  %1939 = vmatprep.mubr.msk.f32.mxu0 %vm126_vm1, %v113_v8  ;;  %374 = vrot.lane.b32.xlu0 %v2428_v10, %s2331_s4  ;;  %v2446_v14 = vld [vmem:[#allocation6] sm:$0xff]  ;;  %v112_v17 = vld [vmem:[#allocation11] sm:$0xff]  ;;  %s2289_s10 = scalar_lea.vmem %s1921_s9, 768  ;;  %p2294_p3 = scmp.lt.s32.totalorder %s1921_s9, %s1921_s9 }
  0x51   :  { %110 = vst.msk [vmem:[#allocation2] sm:$0xff] %vm109_vm2, %v108_v9  ;;  %v2450_v15 = vld [vmem:[#allocation8] sm:$0xff]  ;;  %v2458_v18 = vld [vmem:[#allocation9 + $0x8] sm:$0xff]  ;;  %v2500_v22 = vld [vmem:[#allocation12 + $0x8] sm:$0xff]  ;;  %p2290_p2 = scmp.ne.s32.totalorder %s1921_s9, %s2289_s10  ;;  %p2295_p4 = scmp.lt.s32.totalorder %s2289_s10, %s2289_s10 }
  0x52   :  { %2046 = vmatpush3.xpose.msk.msra.mxu1 %vm109_vm2, %v2416_v5  ;;  %169 = vmatpush1.xpose.msra.mxu0 %v2420_v6  ;;  %v2466_v19 = vld [vmem:[#allocation9] sm:$0xff]  ;;  %v416_v20 = vld [vmem:[#allocation11 + $0x18] sm:$0xff]  ;;  %v2507_v24 = vld [vmem:[#allocation12 + $0x20] sm:$0xff] }
  0x53   :  { %2047 = vmatprep.subr.mxu1 %v2329_v0  ;;  %1937 = vmatprep.subr.msk.mxu0 %vm126_vm1, %v2422_v7  ;;  %v415_v21 = vld [vmem:[#allocation11 + $0x10] sm:$0xff]  ;;  %v716_v33 = vld [vmem:[#allocation11 + $0x28] sm:$0xff]  ;;  %v715_v35 = vld [vmem:[#allocation11 + $0x20] sm:$0xff]  ;;  %p2296_p5 = por %p2295_p4, %p2294_p3 }
  0x54   :  { %676 = vrot.lane.b32.xlu0 %v2500_v22, %s2331_s4  ;;  %v2504_v23 = vld [vmem:[#allocation12 + $0x10] sm:$0xff]  ;;  %v2556_v36 = vld [vmem:[#allocation12 + $0x18] sm:$0xff]  ;;  %v2561_v37 = vld [vmem:[#allocation12 + $0x28] sm:$0xff] }
  0x55   :  { %976 = vrot.lane.b32.xlu1 %v2504_v23, %s2331_s4  ;;  %v1016_v44 = vld [vmem:[#allocation11 + $0x38] sm:$0xff]  ;;  %v1015_v46 = vld [vmem:[#allocation11 + $0x30] sm:$0xff]  ;;  %v1316_v51 = vld [vmem:[#allocation11 + $0x48] sm:$0xff]  ;;  %p2297_p6 = pnand %p2296_p5, %p2290_p2 }
  0x56   :  { %2048 = vmatpush3.xpose.msk.msra.mxu1 %vm109_vm2, %v2432_v11  ;;  %171 = vmatpush1.xpose.msra.mxu0 %v2436_v12  ;;  %v1315_v53 = vld [vmem:[#allocation11 + $0x40] sm:$0xff]  ;;  %v1616_v60 = vld [vmem:[#allocation11 + $0x58] sm:$0xff]  ;;  %v1615_v63 = vld [vmem:[#allocation11 + $0x50] sm:$0xff] }
  0x57   :  { %2049 = vmatprep.subr.mxu1 %v2329_v0  ;;  %1938 = vmatprep.subr.msk.mxu0 %vm126_vm1, %v2440_v13 }
  0x58   :  { %v111_v16 = vld [vmem:[#allocation2] sm:$0xff]  ;;  %1576 = vrot.lane.b32.xlu0 %v2507_v24, %s2331_s4 }
  0x59   :  { %1276 = vrot.lane.b32.xlu1 %v2556_v36, %s2331_s4 }
  0x5a   :  { %2050 = vmatpush3.xpose.msk.msra.mxu1 %vm109_vm2, %v2446_v14  ;;  %173 = vmatpush1.xpose.msra.mxu0 %v2450_v15 }
  0x5b   :  { %1945 = vmatprep.subr.msk.mxu1 %vm126_vm1, %v2402_v1  ;;  %2054 = vmatprep.subr.mxu0 %v2329_v0 }
  0x5c   :  { %385 = vrot.lane.b32.xlu0 %v2428_v10, %s2332_s5 }
  0x5d   :  { %2052 = vmatmul.mubr.msk.f32.vlgmr.msra.gmra.mxu1 %vm109_vm2, %v111_v16  ;;  %207 = vmatmul.mubr.f32.vlgmr.msra.gmra.mxu0 %v112_v17 }
  0x5e   :  { %469 = vmatpush1.xpose.msra.mxu1 %v2406_v3  ;;  %2055 = vmatpush3.xpose.msra.mxu0 %v2458_v18 }
  0x5f   :  { %2058 = vmatprep.mubr.msk.f32.mxu0 %vm2330_vm0, %v2329_v0  ;;  %2056 = vmatprep.subr.mxu0 %v2329_v0 }
  0x60   :  { %1946 = vmatprep.subr.msk.mxu1 %vm126_vm1, %v2412_v4  ;;  %1949 = vmatprep.mubr.msk.f32.mxu1 %vm126_vm1, %v416_v20 }
  0x61   :  { %987 = vrot.lane.b32.xlu0 %v2504_v23, %s2332_s5  ;;  %1876 = vrot.lane.b32.xlu1 %v2561_v37, %s2331_s4 }
  0x62   :  { %471 = vmatpush1.xpose.msra.mxu1 %v2420_v6  ;;  %2057 = vmatpush3.xpose.msra.mxu0 %v2466_v19 }
  0x63   :  { %1947 = vmatprep.subr.msk.mxu1 %vm126_vm1, %v2422_v7  ;;  %2061 = vmatprep.subr.mxu0 %v2329_v0 }
  0x65   :  { %2059 = vmatmul.mubr.f32.vlgmr.msra.gmra.mxu0 %v112_v17  ;;  %687 = vrot.lane.b32.xlu1 %v2500_v22, %s2332_s5 }
  0x66   :  { %473 = vmatpush1.xpose.msra.mxu1 %v2436_v12  ;;  %2062 = vmatpush3.xpose.msk.msra.mxu0 %vm109_vm2, %v2404_v2 }
  0x67   :  { %1948 = vmatprep.subr.msk.mxu1 %vm126_vm1, %v2440_v13  ;;  %2063 = vmatprep.subr.mxu0 %v2329_v0 }
  0x68   :  { %2069 = vmatprep.mubr.msk.f32.mxu0 %vm2330_vm0, %v2329_v0 }
  0x69   :  { %1287 = vrot.lane.b32.xlu1 %v2556_v36, %s2332_s5 }
  0x6a   :  { %475 = vmatpush1.xpose.msra.mxu1 %v2450_v15  ;;  %2064 = vmatpush3.xpose.msk.msra.mxu0 %vm109_vm2, %v2416_v5 }
  0x6b   :  { %2072 = vmatprep.subr.mxu1 %v2329_v0  ;;  %2065 = vmatprep.subr.mxu0 %v2329_v0 }
  0x6d   :  { %509 = vmatmul.mubr.f32.vlgmr.msra.gmra.mxu1 %v415_v21 }
  0x6e   :  { %2066 = vmatpush3.xpose.msk.msra.mxu0 %vm109_vm2, %v2432_v11  ;;  %2073 = vmatpush3.xpose.msra.mxu1 %v2458_v18 }
  0x6f   :  { %2067 = vmatprep.subr.mxu0 %v2329_v0  ;;  %2076 = vmatprep.mubr.msk.f32.mxu1 %vm2330_vm0, %v2329_v0 }
  0x70   :  { %2074 = vmatprep.subr.mxu1 %v2329_v0 }
  0x72   :  { %2068 = vmatpush3.xpose.msk.msra.mxu0 %vm109_vm2, %v2446_v14  ;;  %2075 = vmatpush3.xpose.msra.mxu1 %v2466_v19 }
  0x73   :  { %1955 = vmatprep.subr.msk.mxu0 %vm126_vm1, %v2402_v1  ;;  %2079 = vmatprep.subr.mxu1 %v2329_v0 }
  0x75   :  { %2077 = vmatmul.mubr.f32.vlgmr.msra.gmra.mxu1 %v415_v21 }
  0x76   :  { %2080 = vmatpush3.xpose.msk.msra.mxu1 %vm109_vm2, %v2404_v2  ;;  %2087 = vmatprep.mubr.msk.f32.mxu1 %vm2330_vm0, %v2329_v0 }
  0x77   :  { %2081 = vmatprep.subr.mxu1 %v2329_v0 }
  0x7a   :  { %2082 = vmatpush3.xpose.msk.msra.mxu1 %vm109_vm2, %v2416_v5 }
  0x7b   :  { %2083 = vmatprep.subr.mxu1 %v2329_v0 }
  0x7e   :  { %2084 = vmatpush3.xpose.msk.msra.mxu1 %vm109_vm2, %v2432_v11 }
  0x7f   :  { %2085 = vmatprep.subr.mxu1 %v2329_v0 }
  0x82   :  { %2086 = vmatpush3.xpose.msk.msra.mxu1 %vm109_vm2, %v2446_v14 }
  0x83   :  { %1965 = vmatprep.subr.msk.mxu1 %vm126_vm1, %v2402_v1 }
 0x11d   :  { %v294_v25 = vpop.f32.mrf.mxu1  ;;  %v208_v26 = vpop.f32.mrf.mxu0 }
 0x11e   :  { %v2533_v27 = vadd.f32 %v294_v25, %v208_v26 }
 0x11f   :  { %v2053_v28 = vpop.f32.mrf.mxu1  ;;  %v210_v29 = vpop.f32.mrf.mxu0 }
 0x120   :  { %2070 = vmatmul.mubr.msk.f32.vlgmr.msra.gmra.mxu0 %vm109_vm2, %v2533_v27 }
 0x121   :  { %769 = vmatpush1.xpose.msra.mxu0 %v2406_v3  ;;  %1959 = vmatprep.mubr.msk.f32.mxu0 %vm126_vm1, %v716_v33 }
 0x122   :  { %1956 = vmatprep.subr.msk.mxu0 %vm126_vm1, %v2412_v4 }
 0x125   :  { %v2540_v30 = vpop.f32.mrf.mxu0  ;;  %771 = vmatpush1.xpose.msra.mxu0 %v2420_v6 }
 0x126   :  { %380 = vrot.lane.b32.xlu0 %v2540_v30, %s2333_s29  ;;  %1957 = vmatprep.subr.msk.mxu0 %vm126_vm1, %v2422_v7 }
 0x127   :  { %v2060_v31 = vpop.f32.mrf.mxu0 }
 0x129   :  { %773 = vmatpush1.xpose.msra.mxu0 %v2436_v12 }
 0x12a   :  { %1958 = vmatprep.subr.msk.mxu0 %vm126_vm1, %v2440_v13 }
 0x12d   :  { %775 = vmatpush1.xpose.msra.mxu0 %v2450_v15  ;;  %v510_v32 = vpop.f32.mrf.mxu1 }
 0x12e   :  { %2090 = vmatprep.subr.mxu0 %v2329_v0 }
 0x12f   :  { %v512_v34 = vpop.f32.mrf.mxu1 }
 0x130   :  { %809 = vmatmul.mubr.f32.vlgmr.msra.gmra.mxu0 %v715_v35 }
 0x131   :  { %2091 = vmatpush3.xpose.msra.mxu0 %v2458_v18  ;;  %2094 = vmatprep.mubr.msk.f32.mxu0 %vm2330_vm0, %v2329_v0 }
 0x132   :  { %2092 = vmatprep.subr.mxu0 %v2329_v0 }
 0x135   :  { %v2563_v38 = vpop.f32.mrf.mxu1  ;;  %2093 = vmatpush3.xpose.msra.mxu0 %v2466_v19 }
 0x136   :  { %2097 = vmatprep.subr.mxu0 %v2329_v0  ;;  %682 = vrot.lane.b32.xlu1 %v2563_v38, %s2333_s29 }
 0x137   :  { %v2078_v39 = vpop.f32.mrf.mxu1 }
 0x138   :  { %2095 = vmatmul.mubr.f32.vlgmr.msra.gmra.mxu0 %v715_v35 }
 0x139   :  { %2098 = vmatpush3.xpose.msk.msra.mxu0 %vm109_vm2, %v2404_v2  ;;  %2105 = vmatprep.mubr.msk.f32.mxu0 %vm2330_vm0, %v2329_v0 }
 0x13a   :  { %2099 = vmatprep.subr.mxu0 %v2329_v0 }
 0x13d   :  { %2100 = vmatpush3.xpose.msk.msra.mxu0 %vm109_vm2, %v2416_v5 }
 0x13e   :  { %2101 = vmatprep.subr.mxu0 %v2329_v0 }
 0x141   :  { %2102 = vmatpush3.xpose.msk.msra.mxu0 %vm109_vm2, %v2432_v11 }
 0x142   :  { %2103 = vmatprep.subr.mxu0 %v2329_v0 }
 0x145   :  { %2104 = vmatpush3.xpose.msk.msra.mxu0 %vm109_vm2, %v2446_v14 }
 0x146   :  { %1975 = vmatprep.subr.msk.mxu0 %vm126_vm1, %v2402_v1 }
 0x1e0   :  { %v595_v40 = vpop.f32.mrf.mxu0 }
 0x1e1   :  { %v2590_v41 = vadd.f32 %v595_v40, %v510_v32 }
 0x1e2   :  { %v2071_v42 = vpop.f32.mrf.mxu0 }
 0x1e3   :  { %2088 = vmatmul.mubr.msk.f32.vlgmr.msra.gmra.mxu1 %vm109_vm2, %v2590_v41 }
 0x1e4   :  { %1069 = vmatpush1.xpose.msra.mxu1 %v2406_v3  ;;  %1969 = vmatprep.mubr.msk.f32.mxu1 %vm126_vm1, %v1016_v44 }
 0x1e5   :  { %1966 = vmatprep.subr.msk.mxu1 %vm126_vm1, %v2412_v4 }
 0x1e8   :  { %1071 = vmatpush1.xpose.msra.mxu1 %v2420_v6 }
 0x1e9   :  { %1967 = vmatprep.subr.msk.mxu1 %vm126_vm1, %v2422_v7 }
 0x1ec   :  { %1073 = vmatpush1.xpose.msra.mxu1 %v2436_v12 }
 0x1ed   :  { %1968 = vmatprep.subr.msk.mxu1 %vm126_vm1, %v2440_v13 }
 0x1f0   :  { %1075 = vmatpush1.xpose.msra.mxu1 %v2450_v15  ;;  %v810_v43 = vpop.f32.mrf.mxu0 }
 0x1f1   :  { %2108 = vmatprep.subr.mxu1 %v2329_v0 }
 0x1f2   :  { %v812_v45 = vpop.f32.mrf.mxu0 }
 0x1f3   :  { %1109 = vmatmul.mubr.f32.vlgmr.msra.gmra.mxu1 %v1015_v46 }
 0x1f4   :  { %2109 = vmatpush3.xpose.msra.mxu1 %v2458_v18  ;;  %2112 = vmatprep.mubr.msk.f32.mxu1 %vm2330_vm0, %v2329_v0 }
 0x1f5   :  { %2110 = vmatprep.subr.mxu1 %v2329_v0 }
 0x1f8   :  { %2111 = vmatpush3.xpose.msra.mxu1 %v2466_v19  ;;  %v2627_v47 = vpop.f32.mrf.mxu0 }
 0x1f9   :  { %2115 = vmatprep.subr.mxu1 %v2329_v0  ;;  %982 = vrot.lane.b32.xlu0 %v2627_v47, %s2333_s29 }
 0x1fa   :  { %v2096_v48 = vpop.f32.mrf.mxu0 }
 0x1fb   :  { %2113 = vmatmul.mubr.f32.vlgmr.msra.gmra.mxu1 %v1015_v46 }
 0x1fc   :  { %2116 = vmatpush3.xpose.msk.msra.mxu1 %vm109_vm2, %v2404_v2  ;;  %2123 = vmatprep.mubr.msk.f32.mxu1 %vm2330_vm0, %v2329_v0 }
 0x1fd   :  { %2117 = vmatprep.subr.mxu1 %v2329_v0 }
 0x200   :  { %2118 = vmatpush3.xpose.msk.msra.mxu1 %vm109_vm2, %v2416_v5 }
 0x201   :  { %2119 = vmatprep.subr.mxu1 %v2329_v0 }
 0x204   :  { %2120 = vmatpush3.xpose.msk.msra.mxu1 %vm109_vm2, %v2432_v11 }
 0x205   :  { %2121 = vmatprep.subr.mxu1 %v2329_v0 }
 0x208   :  { %2122 = vmatpush3.xpose.msk.msra.mxu1 %vm109_vm2, %v2446_v14 }
 0x209   :  { %1985 = vmatprep.subr.msk.mxu1 %vm126_vm1, %v2402_v1 }
 0x2a3   :  { %v895_v49 = vpop.f32.mrf.mxu1 }
 0x2a4   :  { %v2631_v50 = vadd.f32 %v895_v49, %v810_v43 }
 0x2a5   :  { %v2089_v52 = vpop.f32.mrf.mxu1 }
 0x2a6   :  { %2106 = vmatmul.mubr.msk.f32.vlgmr.msra.gmra.mxu0 %vm109_vm2, %v2631_v50 }
 0x2a7   :  { %1369 = vmatpush1.xpose.msra.mxu0 %v2406_v3  ;;  %1979 = vmatprep.mubr.msk.f32.mxu0 %vm126_vm1, %v1316_v51 }
 0x2a8   :  { %1976 = vmatprep.subr.msk.mxu0 %vm126_vm1, %v2412_v4 }
 0x2ab   :  { %1371 = vmatpush1.xpose.msra.mxu0 %v2420_v6 }
 0x2ac   :  { %1977 = vmatprep.subr.msk.mxu0 %vm126_vm1, %v2422_v7 }
 0x2af   :  { %1373 = vmatpush1.xpose.msra.mxu0 %v2436_v12 }
 0x2b0   :  { %1978 = vmatprep.subr.msk.mxu0 %vm126_vm1, %v2440_v13 }
 0x2b3   :  { %1375 = vmatpush1.xpose.msra.mxu0 %v2450_v15  ;;  %v1110_v54 = vpop.f32.mrf.mxu1 }
 0x2b4   :  { %2126 = vmatprep.subr.mxu0 %v2329_v0 }
 0x2b5   :  { %v1112_v55 = vpop.f32.mrf.mxu1 }
 0x2b6   :  { %1409 = vmatmul.mubr.f32.vlgmr.msra.gmra.mxu0 %v1315_v53 }
 0x2b7   :  { %2127 = vmatpush3.xpose.msra.mxu0 %v2458_v18  ;;  %2130 = vmatprep.mubr.msk.f32.mxu0 %vm2330_vm0, %v2329_v0 }
 0x2b8   :  { %2128 = vmatprep.subr.mxu0 %v2329_v0 }
 0x2bb   :  { %2129 = vmatpush3.xpose.msra.mxu0 %v2466_v19  ;;  %v2666_v56 = vpop.f32.mrf.mxu1 }
 0x2bc   :  { %2133 = vmatprep.subr.mxu0 %v2329_v0  ;;  %1282 = vrot.lane.b32.xlu1 %v2666_v56, %s2333_s29 }
 0x2bd   :  { %v2114_v57 = vpop.f32.mrf.mxu1 }
 0x2be   :  { %2131 = vmatmul.mubr.f32.vlgmr.msra.gmra.mxu0 %v1315_v53 }
 0x2bf   :  { %2134 = vmatpush3.xpose.msk.msra.mxu0 %vm109_vm2, %v2404_v2  ;;  %2141 = vmatprep.mubr.msk.f32.mxu0 %vm2330_vm0, %v2329_v0 }
 0x2c0   :  { %2135 = vmatprep.subr.mxu0 %v2329_v0 }
 0x2c3   :  { %2136 = vmatpush3.xpose.msk.msra.mxu0 %vm109_vm2, %v2416_v5 }
 0x2c4   :  { %2137 = vmatprep.subr.mxu0 %v2329_v0 }
 0x2c7   :  { %2138 = vmatpush3.xpose.msk.msra.mxu0 %vm109_vm2, %v2432_v11 }
 0x2c8   :  { %2139 = vmatprep.subr.mxu0 %v2329_v0 }
 0x2cb   :  { %2140 = vmatpush3.xpose.msk.msra.mxu0 %vm109_vm2, %v2446_v14 }
 0x366   :  { %v1195_v58 = vpop.f32.mrf.mxu0 }
 0x367   :  { %v2670_v59 = vadd.f32 %v1195_v58, %v1110_v54 }
 0x368   :  { %v2107_v61 = vpop.f32.mrf.mxu0 }
 0x369   :  { %2124 = vmatmul.mubr.msk.f32.vlgmr.msra.gmra.mxu1 %vm109_vm2, %v2670_v59  ;;  %v1273_v52 = vsub.f32 %v2556_v36, %v2670_v59 }
 0x36a   :  { %1669 = vmatpush1.xpose.msra.mxu1 %v2406_v3  ;;  %1989 = vmatprep.mubr.msk.f32.mxu1 %vm126_vm1, %v1616_v60 }
 0x36b   :  { %1986 = vmatprep.subr.msk.mxu1 %vm126_vm1, %v2412_v4  ;;  %v371_v4 = vsub.f32 %v2428_v10, %v2533_v27 }
 0x36d   :  { %v372_v5 = vmax.f32 %v371_v4, 0.0 }
 0x36e   :  { %1671 = vmatpush1.xpose.msra.mxu1 %v2420_v6  ;;  %v973_v6 = vsub.f32 %v2504_v23, %v2631_v50 }
 0x36f   :  { %1987 = vmatprep.subr.msk.mxu1 %vm126_vm1, %v2422_v7  ;;  %v375_v7 = vpop.permute.xlu0 %374 }
 0x370   :  { %v377_v16 = vsub.f32 %v2533_v27, %v375_v7 }
 0x372   :  { %1673 = vmatpush1.xpose.msra.mxu1 %v2436_v12  ;;  %v378_v20 = vmax.f32 %v377_v16, 0.0 }
 0x373   :  { %1988 = vmatprep.subr.msk.mxu1 %vm126_vm1, %v2440_v13  ;;  %v677_v8 = vpop.permute.xlu0 %676 }
 0x374   :  { %v679_v60 = vsub.f32 %v2590_v41, %v677_v8 }
 0x376   :  { %1675 = vmatpush1.xpose.msra.mxu1 %v2450_v15  ;;  %v1410_v62 = vpop.f32.mrf.mxu0 }
 0x377   :  { %2144 = vmatprep.subr.mxu1 %v2329_v0  ;;  %v1577_v9 = vpop.permute.xlu0 %1576 }
 0x378   :  { %v1412_v1 = vpop.f32.mrf.mxu0 }
 0x379   :  { %1709 = vmatmul.mubr.f32.vlgmr.msra.gmra.mxu1 %v1615_v63  ;;  %v680_v1 = vmax.f32 %v679_v60, 0.0 }
 0x37a   :  { %2145 = vmatpush3.xpose.msra.mxu1 %v2458_v18  ;;  %2148 = vmatprep.mubr.msk.f32.mxu1 %vm2330_vm0, %v2329_v0 }
 0x37b   :  { %2146 = vmatprep.subr.mxu1 %v2329_v0  ;;  %v974_v0 = vmax.f32 %v973_v6, 0.0  ;;  %v386_v15 = vpop.permute.xlu0 %385 }
 0x37c   :  { %v388_v51 = vsub.f32 %v2540_v30, %v386_v15  ;;  %v1274_v30 = vmax.f32 %v1273_v52, 0.0 }
 0x37e   :  { %v2690_v2 = vpop.f32.mrf.mxu0  ;;  %2147 = vmatpush3.xpose.msra.mxu1 %v2466_v19  ;;  %v977_v19 = vpop.permute.xlu1 %976  ;;  %v389_v54 = vmax.f32 %v388_v51, 0.0 }
 0x37f   :  { %1582 = vrot.lane.b32.xlu0 %v2690_v2, %s2333_s29  ;;  %v988_v18 = vpop.permute.xlu0 %987  ;;  %v979_v21 = vsub.f32 %v2631_v50, %v977_v19 }
 0x380   :  { %v2132_v3 = vpop.f32.mrf.mxu0  ;;  %v990_v55 = vsub.f32 %v2627_v47, %v988_v18 }
 0x381   :  { %2149 = vmatmul.mubr.f32.vlgmr.msra.gmra.mxu1 %v1615_v63  ;;  %v980_v25 = vmax.f32 %v979_v21, 0.0 }
 0x382   :  { %v1277_v29 = vpop.permute.xlu1 %1276  ;;  %v991_v61 = vmax.f32 %v990_v55, 0.0 }
 0x383   :  { %1587 = vrot.lane.b32.xlu0 %v2507_v24, %s2332_s5  ;;  %v381_v28 = vpop.permute.xlu0 %380  ;;  %v1279_v47 = vsub.f32 %v2670_v59, %v1277_v29 }
 0x384   :  { %v383_v32 = vsub.f32 %v2428_v10, %v381_v28 }
 0x385   :  { %v1280_v4 = vmax.f32 %v1279_v47, 0.0 }
 0x386   :  { %v384_v39 = vmax.f32 %v383_v32, 0.0  ;;  %v2720_v42 = vpop.permute.xlu1 %1876 }
 0x387   :  { %391 = vrot.lane.b32.xlu0 %v372_v5, %s2334_s30  ;;  %v983_v34 = vpop.permute.xlu0 %982 }
 0x388   :  { %v985_v40 = vsub.f32 %v2504_v23, %v983_v34  ;;  %v673_v23 = vsub.f32 %v2500_v22, %v2590_v41 }
 0x38a   :  { %v986_v46 = vmax.f32 %v985_v40, 0.0  ;;  %v688_v49 = vpop.permute.xlu1 %687 }
 0x38b   :  { %993 = vrot.lane.b32.xlu0 %v974_v0, %s2334_s30  ;;  %v690_v7 = vsub.f32 %v2563_v38, %v688_v49 }
 0x38d   :  { %v691_v8 = vmax.f32 %v690_v7, 0.0 }
 0x38e   :  { %v1288_v53 = vpop.permute.xlu1 %1287 }
 0x3f1   :  { %v1583_v43 = vpop.permute.xlu0 %1582 }
 0x3f2   :  { %v1585_v44 = vsub.f32 %v2507_v24, %v1583_v43 }
 0x3f4   :  { %v1586_v48 = vmax.f32 %v1585_v44, 0.0 }
 0x3f5   :  { %v1588_v57 = vpop.permute.xlu0 %1587 }
 0x3f6   :  { %v1590_v58 = vsub.f32 %v2690_v2, %v1588_v57 }
 0x3f8   :  { %v1591_v63 = vmax.f32 %v1590_v58, 0.0 }
 0x429   :  { %v1495_v11 = vpop.f32.mrf.mxu1 }
 0x42a   :  { %v2703_v12 = vadd.f32 %v1495_v11, %v1410_v62  ;;  %v683_v62 = vpop.permute.xlu1 %682  ;;  %v392_v11 = vpop.permute.xlu0 %391 }
 0x42b   :  { %v2125_v13 = vpop.f32.mrf.mxu1  ;;  %v685_v2 = vsub.f32 %v2500_v22, %v683_v62 }
 0x42c   :  { %2142 = vmatmul.mubr.msk.f32.vlgmr.msra.gmra.mxu0 %vm109_vm2, %v2703_v12  ;;  %v1573_v14 = vsub.f32 %v2507_v24, %v2703_v12  ;;  %v1579_v26 = vsub.f32 %v2703_v12, %v1577_v9  ;;  %v674_v24 = vmax.f32 %v673_v23, 0.0  ;;  %v1290_v9 = vsub.f32 %v2666_v56, %v1288_v53 }
 0x42d   :  { %v686_v6 = vmax.f32 %v685_v2, 0.0 }
 0x42e   :  { %v1574_v17 = vmax.f32 %v1573_v14, 0.0  ;;  %v1580_v33 = vmax.f32 %v1579_v26, 0.0  ;;  %v1283_v3 = vpop.permute.xlu1 %1282  ;;  %v1291_v22 = vmax.f32 %v1290_v9, 0.0  ;;  %v994_v13 = vpop.permute.xlu0 %993 }
 0x42f   :  { %v1285_v5 = vsub.f32 %v2556_v36, %v1283_v3  ;;  %v1008_v34 = vsel %vm109_vm2, %v2631_v50, %v994_v13 }
 0x430   :  { %1593 = vrot.lane.b32.xlu0 %v1574_v17, %s2334_s30 }
 0x431   :  { %v1286_v0 = vmax.f32 %v1285_v5, 0.0 }
 0x434   :  { %395 = vrot.lane.b32.xlu0 %v378_v20, %s2333_s29 }
 0x438   :  { %997 = vrot.lane.b32.xlu0 %v980_v25, %s2333_s29  ;;  %v406_v25 = vsel %vm109_vm2, %v2533_v27, %v392_v11 }
 0x439   :  { %v2715_v31 = vpop.f32.mrf.mxu1 }
 0x43b   :  { %v1712_v35 = vpop.f32.mrf.mxu1 }
 0x43c   :  { %1597 = vrot.lane.b32.xlu0 %v1580_v33, %s2333_s29 }
 0x440   :  { %399 = vrot.lane.b32.xlu0 %v384_v39, %s2334_s30 }
 0x441   :  { %v2724_v45 = vpop.f32.mrf.mxu1 }
 0x442   :  { %1882 = vrot.lane.b32.xlu1 %v2724_v45, %s2333_s29 }
 0x443   :  { %v2150_v10 = vpop.f32.mrf.mxu1 }
 0x444   :  { %1001 = vrot.lane.b32.xlu0 %v986_v46, %s2334_s30 }
 0x446   :  { %1887 = vrot.lane.b32.xlu1 %v2561_v37, %s2332_s5 }
 0x448   :  { %1601 = vrot.lane.b32.xlu0 %v1586_v48, %s2334_s30 }
 0x44a   :  { %693 = vrot.lane.b32.xlu1 %v674_v24, %s2334_s30 }
 0x44c   :  { %403 = vrot.lane.b32.xlu0 %v389_v54, %s2335_s7 }
 0x44e   :  { %1293 = vrot.lane.b32.xlu1 %v1274_v30, %s2334_s30 }
 0x450   :  { %1005 = vrot.lane.b32.xlu0 %v991_v61, %s2335_s7 }
 0x452   :  { %697 = vrot.lane.b32.xlu1 %v680_v1, %s2333_s29 }
 0x454   :  { %1605 = vrot.lane.b32.xlu0 %v1591_v63, %s2335_s7 }
 0x456   :  { %1297 = vrot.lane.b32.xlu1 %v1280_v4, %s2333_s29 }
 0x45a   :  { %701 = vrot.lane.b32.xlu1 %v686_v6, %s2334_s30 }
 0x45e   :  { %1301 = vrot.lane.b32.xlu1 %v1286_v0, %s2334_s30 }
 0x462   :  { %705 = vrot.lane.b32.xlu1 %v691_v8, %s2335_s7 }
 0x466   :  { %1305 = vrot.lane.b32.xlu1 %v1291_v22, %s2335_s7 }
 0x4a2   :  { %v1594_v14 = vpop.permute.xlu0 %1593 }
 0x4a3   :  { %v1608_v44 = vsel %vm109_vm2, %v2703_v12, %v1594_v14 }
 0x4a6   :  { %v396_v36 = vpop.permute.xlu0 %395 }
 0x4a7   :  { %v408_v28 = vsel %vm407_vm3, %v406_v25, %v396_v36 }
 0x4aa   :  { %v998_v15 = vpop.permute.xlu0 %997 }
 0x4ab   :  { %v1009_v39 = vsel %vm407_vm3, %v1008_v34, %v998_v15 }
 0x4ae   :  { %v1598_v16 = vpop.permute.xlu0 %1597 }
 0x4af   :  { %v1609_v10 = vsel %vm407_vm3, %v1608_v44, %v1598_v16 }
 0x4b2   :  { %v400_v17 = vpop.permute.xlu0 %399 }
 0x4b3   :  { %v410_v29 = vsel %vm409_vm4, %v408_v28, %v400_v17 }
 0x4b4   :  { %v1883_v18 = vpop.permute.xlu1 %1882 }
 0x4b5   :  { %v1885_v38 = vsub.f32 %v2561_v37, %v1883_v18 }
 0x4b6   :  { %v1002_v19 = vpop.permute.xlu0 %1001 }
 0x4b7   :  { %v1886_v20 = vmax.f32 %v1885_v38, 0.0  ;;  %v1010_v40 = vsel %vm409_vm4, %v1009_v39, %v1002_v19 }
 0x4b8   :  { %v1888_v21 = vpop.permute.xlu1 %1887 }
 0x4b9   :  { %1901 = vrot.lane.b32.xlu1 %v1886_v20, %s2334_s30  ;;  %v1890_v3 = vsub.f32 %v2724_v45, %v1888_v21 }
 0x4ba   :  { %v1602_v56 = vpop.permute.xlu0 %1601 }
 0x4bb   :  { %v1610_v48 = vsel %vm409_vm4, %v1609_v10, %v1602_v56  ;;  %v1891_v4 = vmax.f32 %v1890_v3, 0.0 }
 0x4bc   :  { %v694_v26 = vpop.permute.xlu1 %693 }
 0x4bd   :  { %v708_v52 = vsel %vm109_vm2, %v2590_v41, %v694_v26 }
 0x4be   :  { %v404_v32 = vpop.permute.xlu0 %403 }
 0x4bf   :  { %v412_v33 = vsel %vm411_vm5, %v410_v29, %v404_v32 }
 0x4c0   :  { %413 = vst [vmem:[#allocation14] sm:$0xff] %v412_v33  ;;  %v1294_v35 = vpop.permute.xlu1 %1293 }
 0x4c1   :  { %v1308_v57 = vsel %vm109_vm2, %v2670_v59, %v1294_v35 }
 0x4c2   :  { %v1006_v43 = vpop.permute.xlu0 %1005 }
 0x4c3   :  { %v1011_v27 = vsel %vm411_vm5, %v1010_v40, %v1006_v43 }
 0x4c4   :  { %1013 = vst [vmem:[#allocation14 + $0x10] sm:$0xff] %v1011_v27  ;;  %v698_v46 = vpop.permute.xlu1 %697 }
 0x4c5   :  { %v709_v53 = vsel %vm407_vm3, %v708_v52, %v698_v46 }
 0x4c6   :  { %v1606_v23 = vpop.permute.xlu0 %1605 }
 0x4c7   :  { %v1611_v50 = vsel %vm411_vm5, %v1610_v48, %v1606_v23 }
 0x4c8   :  { %1613 = vst [vmem:[#allocation14 + $0x20] sm:$0xff] %v1611_v50  ;;  %v1298_v49 = vpop.permute.xlu1 %1297 }
 0x4c9   :  { %v1309_v58 = vsel %vm407_vm3, %v1308_v57, %v1298_v49 }
 0x4cc   :  { %v702_v51 = vpop.permute.xlu1 %701 }
 0x4cd   :  { %v710_v12 = vsel %vm409_vm4, %v709_v53, %v702_v51 }
 0x4d0   :  { %v1302_v24 = vpop.permute.xlu1 %1301 }
 0x4d1   :  { %v1310_v30 = vsel %vm409_vm4, %v1309_v58, %v1302_v24 }
 0x4d4   :  { %v706_v54 = vpop.permute.xlu1 %705 }
 0x4d5   :  { %v711_v55 = vsel %vm411_vm5, %v710_v12, %v706_v54 }
 0x4d6   :  { %713 = vst [vmem:[#allocation14 + $0x8] sm:$0xff] %v711_v55 }
 0x4d8   :  { %v1306_v60 = vpop.permute.xlu1 %1305 }
 0x4d9   :  { %v1311_v61 = vsel %vm411_vm5, %v1310_v30, %v1306_v60 }
 0x4da   :  { %1313 = vst [vmem:[#allocation14 + $0x18] sm:$0xff] %v1311_v61 }
 0x4ec   :  { %v1795_v41 = vpop.f32.mrf.mxu0 }
 0x4ed   :  { %v1796_v62 = vadd.f32 %v1795_v41, %v2715_v31 }
 0x4ee   :  { %v2143_v63 = vpop.f32.mrf.mxu0 }
 0x4ef   :  { %1914 = vst.msk [vmem:[#allocation2] sm:$0xff] %vm109_vm2, %v1796_v62  ;;  %v1873_v1 = vsub.f32 %v2561_v37, %v1796_v62  ;;  %v1879_v59 = vsub.f32 %v1796_v62, %v2720_v42 }
 0x4f1   :  { %v1874_v47 = vmax.f32 %v1873_v1, 0.0  ;;  %v1880_v2 = vmax.f32 %v1879_v59, 0.0 }
 0x4f3   :  { %1893 = vrot.lane.b32.xlu1 %v1874_v47, %s2334_s30 }
 0x4f7   :  { %1897 = vrot.lane.b32.xlu1 %v1880_v2, %s2333_s29 }
 0x4fb   :  { %1905 = vrot.lane.b32.xlu1 %v1891_v4, %s2335_s7 }
 0x52b   :  { %v1902_v5 = vpop.permute.xlu1 %1901 }
 0x565   :  { %v1894_v31 = vpop.permute.xlu1 %1893 }
 0x566   :  { %v1908_v6 = vsel %vm109_vm2, %v1796_v62, %v1894_v31 }
 0x569   :  { %v1898_v0 = vpop.permute.xlu1 %1897 }
 0x56a   :  { %v1909_v37 = vsel %vm407_vm3, %v1908_v6, %v1898_v0 }
 0x56b   :  { %v1910_v42 = vsel %vm409_vm4, %v1909_v37, %v1902_v5 }
 0x56d   :  { %v1906_v7 = vpop.permute.xlu1 %1905 }
 0x56e   :  { %v1911_v45 = vsel %vm411_vm5, %v1910_v42, %v1906_v7 }
 0x56f   :  { %1913 = vst [vmem:[#allocation14 + $0x28] sm:$0xff] %v1911_v45 }
 0x570   :  { %2300 = shalt.err (!%p2297_p6)
}
 0x571   :  { %1926 = dma.vmem_to_hbm [thread:$0]  %s1921_s9, 768, %s2807_s6, [#allocation5], %s2320_s24, %s2320_s24, %s2321_s25  }
 0x572   :  { %2317 = dma.done.wait [#allocation5], 768  }
 0x573   :  { %2318 = vsyncadd [#allocation5], 4294966528 }
 0x574   :  { %1930 = vsyncpa [#allocation4], 1 }
 0x575   :  { %1931 = vsyncpa [#allocation7], 1 }
 0x576   :  { %1932 = vsyncpa [#allocation10], 1 }
 0x577   :  { %1933 = vsyncpa [#allocation13], 1 }
 0x578   :  { %1934 = vsyncpa [#allocation5], 1 }

</bundles_post_ra>
